<compile_context>
chip_gen: v7x
topology: tpu7x:2x2x1
jax: 0.10.0
libtpu: 0.0.40
codegen_flags: <defaults>
</compile_context>

<pallas_src>
import jax
import jax.numpy as jnp
from jax.experimental import pallas as pl
from jax.experimental.pallas import tpu as pltpu

INPUT_SIZE = 768
HIDDEN = 128
OUTPUT_SIZE = 4672

TN = 2432                                  # fc3 output tile (19 * 128 lanes)
OUT_PAD = 4864                             # 4672 padded to 2 * TN (= 38 * 128)
NJ = OUT_PAD // TN                         # = 2 grid steps over fc3 output dim
NEG_BIG = -1e30                            # padded-logit bias (exp -> 0)


def actor_kernel(x_ref, w1_ref, b1_ref, w2_ref, b2_ref, w3_ref, b3_ref,
                 o_ref, h2_ref, m_ref, d_ref):
    j = pl.program_id(0)
    nj = pl.num_programs(0)

    # --- once: fc1 + ReLU, fc2 + ReLU into bf16 VMEM scratch; init softmax state
    @pl.when(j == 0)
    def _():
        xb = x_ref[...].astype(jnp.bfloat16)
        h1 = jnp.dot(xb, w1_ref[...], preferred_element_type=jnp.float32)
        h1 = jnp.maximum(h1 + b1_ref[...], 0.0)
        h2 = jnp.dot(h1.astype(jnp.bfloat16), w2_ref[...],
                     preferred_element_type=jnp.float32)
        h2_ref[...] = jnp.maximum(h2 + b2_ref[...], 0.0).astype(jnp.bfloat16)
        m_ref[...] = jnp.full(m_ref.shape, -jnp.inf, dtype=m_ref.dtype)
        d_ref[...] = jnp.zeros_like(d_ref)

    # --- per tile: fc3 logits (bf16 in, f32 accum) -> online softmax numerators
    logits = jnp.dot(h2_ref[...], w3_ref[...],
                     preferred_element_type=jnp.float32) + b3_ref[...]
    m_old = m_ref[...]
    m_new = jnp.maximum(m_old, jnp.max(logits, axis=-1, keepdims=True))
    a = jnp.exp(m_old - m_new)                      # rescale factor for old state
    p = jnp.exp(logits - m_new)
    d_ref[...] = a * d_ref[...] + jnp.sum(p, axis=-1, keepdims=True)
    m_ref[...] = m_new

    col0 = pl.multiple_of(j * TN, 128)

    # Intermediate steps (only exist if NJ > 2): keep earlier numerator tiles
    # expressed against the running max. Empty (compiled away) for NJ=2.
    for jj in range(max(NJ - 2, 0)):
        @pl.when(jnp.logical_and(jj < j, j < nj - 1))
        def _(jj=jj):
            c = slice(jj * TN, (jj + 1) * TN)
            o_ref[:, c] = o_ref[:, c] * a

    @pl.when(j < nj - 1)
    def _():
        o_ref[:, pl.ds(col0, TN)] = p

    # --- last tile: write it already normalized; single rescale of earlier tiles
    @pl.when(j == nj - 1)
    def _():
        r = pl.reciprocal(d_ref[...], approx=False)
        o_ref[:, pl.ds(col0, TN)] = p * r
        s = a * r                                   # exp(m_prev - m_final) / denom
        for jj in range(NJ - 1):
            c = slice(jj * TN, (jj + 1) * TN)
            o_ref[:, c] = o_ref[:, c] * s


def actor_forward(x, params):
    w1, b1, w2, b2, w3, b3 = params
    B = x.shape[0]

    const = lambda shape: pl.BlockSpec(shape, lambda j, s=shape: (0,) * len(s))

    out = pl.pallas_call(
        actor_kernel,
        out_shape=jax.ShapeDtypeStruct((B, OUT_PAD), jnp.float32),
        grid=(NJ,),
        in_specs=[
            const((B, INPUT_SIZE)),
            const((INPUT_SIZE, HIDDEN)), const((1, HIDDEN)),
            const((HIDDEN, HIDDEN)), const((1, HIDDEN)),
            pl.BlockSpec((HIDDEN, TN), lambda j: (0, j)),   # streamed w3 tiles
            pl.BlockSpec((1, TN), lambda j: (0, j)),        # streamed b3 tiles
        ],
        out_specs=const((B, OUT_PAD)),                       # VMEM-resident output
        scratch_shapes=[
            pltpu.VMEM((B, HIDDEN), jnp.bfloat16),           # h2 (bf16, cast once)
            pltpu.VMEM((B, 1), jnp.float32),                 # running max
            pltpu.VMEM((B, 1), jnp.float32),                 # running denominator
        ],
        compiler_params=pltpu.CompilerParams(
            dimension_semantics=("arbitrary",),
            vmem_limit_bytes=16 << 20,
        ),
    )(x, w1, b1, w2, b2, w3, b3)
    return out[:, :OUTPUT_SIZE]


def init_params(key):
    k1, k2, k3 = jax.random.split(key, 3)

    # PyTorch-Linear-like uniform init: U(-1/sqrt(fan_in), 1/sqrt(fan_in))
    def linear(k, fan_in, fan_out):
        kw, kb = jax.random.split(k)
        bound = 1.0 / jnp.sqrt(jnp.float32(fan_in))
        w = jax.random.uniform(kw, (fan_in, fan_out), jnp.float32, -bound, bound)
        b = jax.random.uniform(kb, (1, fan_out), jnp.float32, -bound, bound)
        return w, b

    w1, b1 = linear(k1, INPUT_SIZE, HIDDEN)
    w2, b2 = linear(k2, HIDDEN, HIDDEN)
    w3, b3 = linear(k3, HIDDEN, OUTPUT_SIZE)

    # bf16 weights (f32 accumulation happens in the kernel); f32 biases.
    w1 = w1.astype(jnp.bfloat16)
    w2 = w2.astype(jnp.bfloat16)
    # Pad fc3 output dim to OUT_PAD: zero weight columns, -1e30 bias so the
    # padded logits vanish under exp() in the softmax.
    w3p = jnp.zeros((HIDDEN, OUT_PAD), jnp.float32).at[:, :OUTPUT_SIZE].set(w3)
    b3p = jnp.full((1, OUT_PAD), NEG_BIG, jnp.float32).at[:, :OUTPUT_SIZE].set(b3)
    w3p = w3p.astype(jnp.bfloat16)
    return (w1, b1, w2, b2, w3p, b3p)


def reference_forward(x, params):
    # Same mixed-precision math (bf16 weights, f32 accumulation) in pure JAX.
    w1, b1, w2, b2, w3, b3 = params
    xb = x.astype(jnp.bfloat16)
    h1 = jnp.maximum(
        jnp.dot(xb, w1, preferred_element_type=jnp.float32) + b1, 0.0)
    h2 = jnp.maximum(
        jnp.dot(h1.astype(jnp.bfloat16), w2,
                preferred_element_type=jnp.float32) + b2, 0.0)
    logits = jnp.dot(h2.astype(jnp.bfloat16), w3[:, :OUTPUT_SIZE],
                     preferred_element_type=jnp.float32) + b3[:, :OUTPUT_SIZE]
    return jax.nn.softmax(logits, axis=-1)


if __name__ == "__main__":
    key = jax.random.PRNGKey(0)
    kx, kp = jax.random.split(key)

    B = 8
    x = jax.random.normal(kx, (B, INPUT_SIZE), jnp.float32)
    params = init_params(kp)

    out = jax.block_until_ready(actor_forward(x, params))
    ref = jax.block_until_ready(reference_forward(x, params))

    assert out.shape == (B, OUTPUT_SIZE)
    # rows of a softmax sum to 1
    assert jnp.allclose(jnp.sum(out, axis=-1), 1.0, atol=1e-4)
    assert jnp.allclose(out, ref, atol=2e-5, rtol=1e-3)

    print("KERNEL_OK")
</pallas_src>

<mosaic_0001>
module attributes {stable_mosaic.version = 11 : i64} {
  func.func @actor_kernel(%arg0: i32, %arg1: memref<8x768xf32, #tpu.memory_space<vmem>>, %arg2: memref<768x128xbf16, #tpu.memory_space<vmem>>, %arg3: memref<1x128xf32, #tpu.memory_space<vmem>>, %arg4: memref<128x128xbf16, #tpu.memory_space<vmem>>, %arg5: memref<1x128xf32, #tpu.memory_space<vmem>>, %arg6: memref<128x2432xbf16, #tpu.memory_space<vmem>>, %arg7: memref<1x2432xf32, #tpu.memory_space<vmem>>, %arg8: memref<8x4864xf32, #tpu.memory_space<vmem>>, %arg9: memref<8x128xbf16, #tpu.memory_space<vmem>>, %arg10: memref<8x1xf32, #tpu.memory_space<vmem>>, %arg11: memref<8x1xf32, #tpu.memory_space<vmem>>) attributes {dimension_semantics = [#tpu.dimension_semantics<arbitrary>], iteration_bounds = array<i64: 2>, scalar_prefetch = 0 : i64, scratch_operands = 3 : i64, tpu.core_type = #tpu.core_type<tc>, window_params = [{pipeline_mode = #tpu.pipeline_mode<synchronous>, transform_indices = @transform_0, window_bounds = array<i64: 8, 768>}, {pipeline_mode = #tpu.pipeline_mode<synchronous>, transform_indices = @transform_1, window_bounds = array<i64: 768, 128>}, {pipeline_mode = #tpu.pipeline_mode<synchronous>, transform_indices = @transform_2, window_bounds = array<i64: 1, 128>}, {pipeline_mode = #tpu.pipeline_mode<synchronous>, transform_indices = @transform_3, window_bounds = array<i64: 128, 128>}, {pipeline_mode = #tpu.pipeline_mode<synchronous>, transform_indices = @transform_4, window_bounds = array<i64: 1, 128>}, {transform_indices = @transform_5, window_bounds = array<i64: 128, 2432>}, {transform_indices = @transform_6, window_bounds = array<i64: 1, 2432>}, {pipeline_mode = #tpu.pipeline_mode<synchronous>, transform_indices = @transform_7, window_bounds = array<i64: 8, 4864>}]} {
    %c0_i32 = arith.constant 0 : i32
    %0 = arith.cmpi eq, %arg0, %c0_i32 : i32
    %1 = arith.extui %0 : i1 to i32
    %c0_i32_0 = arith.constant 0 : i32
    %2 = arith.cmpi ne, %1, %c0_i32_0 : i32
    scf.if %2 {
      %c0_19 = arith.constant 0 : index
      %c0_20 = arith.constant 0 : index
      %33 = vector.load %arg1[%c0_19, %c0_20] : memref<8x768xf32, #tpu.memory_space<vmem>>, vector<8x768xf32>
      %34 = arith.truncf %33 : vector<8x768xf32> to vector<8x768xbf16>
      %c0_21 = arith.constant 0 : index
      %c0_22 = arith.constant 0 : index
      %35 = vector.load %arg2[%c0_21, %c0_22] : memref<768x128xbf16, #tpu.memory_space<vmem>>, vector<768x128xbf16>
      %cst_23 = arith.constant dense<0.000000e+00> : vector<8x128xf32>
      %36 = tpu.matmul %34, %35, %cst_23 {dimension_numbers = #tpu.dot_dimension_numbers<[1], [0], [0], [1], [0, 0, 1, 1], [], []>} : vector<8x768xbf16>, vector<768x128xbf16>, vector<8x128xf32> -> vector<8x128xf32>
      %c0_24 = arith.constant 0 : index
      %c0_25 = arith.constant 0 : index
      %37 = vector.load %arg3[%c0_24, %c0_25] : memref<1x128xf32, #tpu.memory_space<vmem>>, vector<1x128xf32>
      %38 = vector.broadcast %37 : vector<1x128xf32> to vector<8x128xf32>
      %39 = arith.addf %36, %38 : vector<8x128xf32>
      %cst_26 = arith.constant 0.000000e+00 : f32
      %40 = vector.broadcast %cst_26 : f32 to vector<8x128xf32>
      %41 = arith.maximumf %39, %40 : vector<8x128xf32>
      %42 = arith.truncf %41 : vector<8x128xf32> to vector<8x128xbf16>
      %c0_27 = arith.constant 0 : index
      %c0_28 = arith.constant 0 : index
      %43 = vector.load %arg4[%c0_27, %c0_28] : memref<128x128xbf16, #tpu.memory_space<vmem>>, vector<128x128xbf16>
      %cst_29 = arith.constant dense<0.000000e+00> : vector<8x128xf32>
      %44 = tpu.matmul %42, %43, %cst_29 {dimension_numbers = #tpu.dot_dimension_numbers<[1], [0], [0], [1], [0, 0, 1, 1], [], []>} : vector<8x128xbf16>, vector<128x128xbf16>, vector<8x128xf32> -> vector<8x128xf32>
      %c0_30 = arith.constant 0 : index
      %c0_31 = arith.constant 0 : index
      %45 = vector.load %arg5[%c0_30, %c0_31] : memref<1x128xf32, #tpu.memory_space<vmem>>, vector<1x128xf32>
      %46 = vector.broadcast %45 : vector<1x128xf32> to vector<8x128xf32>
      %47 = arith.addf %44, %46 : vector<8x128xf32>
      %cst_32 = arith.constant 0.000000e+00 : f32
      %48 = vector.broadcast %cst_32 : f32 to vector<8x128xf32>
      %49 = arith.maximumf %47, %48 : vector<8x128xf32>
      %50 = arith.truncf %49 : vector<8x128xf32> to vector<8x128xbf16>
      %c0_33 = arith.constant 0 : index
      %c0_34 = arith.constant 0 : index
      %51 = vector.load %arg9[%c0_33, %c0_34] : memref<8x128xbf16, #tpu.memory_space<vmem>>, vector<8x128xbf16>
      tpu.vector_store %arg9[%c0_33, %c0_34], %50 {strides = array<i32>} : memref<8x128xbf16, #tpu.memory_space<vmem>>, vector<8x128xbf16>,
      %cst_35 = arith.constant 0xFF800000 : f32
      %52 = vector.broadcast %cst_35 : f32 to vector<8x1xf32>
      %c0_36 = arith.constant 0 : index
      %c0_37 = arith.constant 0 : index
      %53 = vector.load %arg10[%c0_36, %c0_37] : memref<8x1xf32, #tpu.memory_space<vmem>>, vector<8x1xf32>
      tpu.vector_store %arg10[%c0_36, %c0_37], %52 {strides = array<i32>} : memref<8x1xf32, #tpu.memory_space<vmem>>, vector<8x1xf32>,
      %cst_38 = arith.constant 0.000000e+00 : f32
      %54 = vector.broadcast %cst_38 : f32 to vector<8x1xf32>
      %c0_39 = arith.constant 0 : index
      %c0_40 = arith.constant 0 : index
      %55 = vector.load %arg11[%c0_39, %c0_40] : memref<8x1xf32, #tpu.memory_space<vmem>>, vector<8x1xf32>
      tpu.vector_store %arg11[%c0_39, %c0_40], %54 {strides = array<i32>} : memref<8x1xf32, #tpu.memory_space<vmem>>, vector<8x1xf32>,
    } else {
    }
    %c0 = arith.constant 0 : index
    %c0_1 = arith.constant 0 : index
    %3 = vector.load %arg9[%c0, %c0_1] : memref<8x128xbf16, #tpu.memory_space<vmem>>, vector<8x128xbf16>
    %c0_2 = arith.constant 0 : index
    %c0_3 = arith.constant 0 : index
    %4 = vector.load %arg6[%c0_2, %c0_3] : memref<128x2432xbf16, #tpu.memory_space<vmem>>, vector<128x2432xbf16>
    %cst = arith.constant dense<0.000000e+00> : vector<8x2432xf32>
    %5 = tpu.matmul %3, %4, %cst {dimension_numbers = #tpu.dot_dimension_numbers<[1], [0], [0], [1], [0, 0, 1, 1], [], []>} : vector<8x128xbf16>, vector<128x2432xbf16>, vector<8x2432xf32> -> vector<8x2432xf32>
    %c0_4 = arith.constant 0 : index
    %c0_5 = arith.constant 0 : index
    %6 = vector.load %arg7[%c0_4, %c0_5] : memref<1x2432xf32, #tpu.memory_space<vmem>>, vector<1x2432xf32>
    %7 = vector.broadcast %6 : vector<1x2432xf32> to vector<8x2432xf32>
    %8 = arith.addf %5, %7 : vector<8x2432xf32>
    %c0_6 = arith.constant 0 : index
    %c0_7 = arith.constant 0 : index
    %9 = vector.load %arg10[%c0_6, %c0_7] : memref<8x1xf32, #tpu.memory_space<vmem>>, vector<8x1xf32>
    %cst_8 = arith.constant dense<0xFF800000> : vector<8xf32>
    %10 = vector.multi_reduction <maximumf>, %8, %cst_8 [1] : vector<8x2432xf32> to vector<8xf32>
    %11 = vector.shape_cast %10 : vector<8xf32> to vector<8x1xf32>
    %12 = arith.maximumf %9, %11 : vector<8x1xf32>
    %13 = arith.subf %9, %12 : vector<8x1xf32>
    %14 = math.exp %13 : vector<8x1xf32>
    %15 = vector.broadcast %12 : vector<8x1xf32> to vector<8x2432xf32>
    %16 = arith.subf %8, %15 : vector<8x2432xf32>
    %17 = math.exp %16 : vector<8x2432xf32>
    %c0_9 = arith.constant 0 : index
    %c0_10 = arith.constant 0 : index
    %18 = vector.load %arg11[%c0_9, %c0_10] : memref<8x1xf32, #tpu.memory_space<vmem>>, vector<8x1xf32>
    %19 = arith.mulf %14, %18 : vector<8x1xf32>
    %cst_11 = arith.constant dense<0.000000e+00> : vector<8xf32>
    %20 = vector.multi_reduction <add>, %17, %cst_11 [1] : vector<8x2432xf32> to vector<8xf32>
    %21 = vector.shape_cast %20 : vector<8xf32> to vector<8x1xf32>
    %22 = arith.addf %19, %21 : vector<8x1xf32>
    %c0_12 = arith.constant 0 : index
    %c0_13 = arith.constant 0 : index
    %23 = vector.load %arg11[%c0_12, %c0_13] : memref<8x1xf32, #tpu.memory_space<vmem>>, vector<8x1xf32>
    tpu.vector_store %arg11[%c0_12, %c0_13], %22 {strides = array<i32>} : memref<8x1xf32, #tpu.memory_space<vmem>>, vector<8x1xf32>,
    %c0_14 = arith.constant 0 : index
    %c0_15 = arith.constant 0 : index
    %24 = vector.load %arg10[%c0_14, %c0_15] : memref<8x1xf32, #tpu.memory_space<vmem>>, vector<8x1xf32>
    tpu.vector_store %arg10[%c0_14, %c0_15], %12 {strides = array<i32>} : memref<8x1xf32, #tpu.memory_space<vmem>>, vector<8x1xf32>,
    %c2432_i32 = arith.constant 2432 : i32
    %25 = arith.muli %arg0, %c2432_i32 : i32
    %26 = tpu.assume_multiple %25, 128 : i32
    %c1_i32 = arith.constant 1 : i32
    %27 = arith.cmpi slt, %arg0, %c1_i32 : i32
    %28 = arith.extui %27 : i1 to i32
    %c0_i32_16 = arith.constant 0 : i32
    %29 = arith.cmpi ne, %28, %c0_i32_16 : i32
    scf.if %29 {
      %c0_19 = arith.constant 0 : index
      %33 = arith.index_cast %26 : i32 to index
      %34 = vector.load %arg8[%c0_19, %33] : memref<8x4864xf32, #tpu.memory_space<vmem>>, vector<8x2432xf32>
      tpu.vector_store %arg8[%c0_19, %33], %17 {strides = array<i32>} : memref<8x4864xf32, #tpu.memory_space<vmem>>, vector<8x2432xf32>,
    } else {
    }
    %c1_i32_17 = arith.constant 1 : i32
    %30 = arith.cmpi eq, %arg0, %c1_i32_17 : i32
    %31 = arith.extui %30 : i1 to i32
    %c0_i32_18 = arith.constant 0 : i32
    %32 = arith.cmpi ne, %31, %c0_i32_18 : i32
    scf.if %32 {
      %c0_19 = arith.constant 0 : index
      %c0_20 = arith.constant 0 : index
      %33 = vector.load %arg11[%c0_19, %c0_20] : memref<8x1xf32, #tpu.memory_space<vmem>>, vector<8x1xf32>
      %34 = tpu.reciprocal %33 : vector<8x1xf32> -> vector<8x1xf32>
      %35 = vector.broadcast %34 : vector<8x1xf32> to vector<8x2432xf32>
      %36 = arith.mulf %17, %35 : vector<8x2432xf32>
      %c0_21 = arith.constant 0 : index
      %37 = arith.index_cast %26 : i32 to index
      %38 = vector.load %arg8[%c0_21, %37] : memref<8x4864xf32, #tpu.memory_space<vmem>>, vector<8x2432xf32>
      tpu.vector_store %arg8[%c0_21, %37], %36 {strides = array<i32>} : memref<8x4864xf32, #tpu.memory_space<vmem>>, vector<8x2432xf32>,
      %39 = arith.mulf %14, %34 : vector<8x1xf32>
      %c0_22 = arith.constant 0 : index
      %c0_23 = arith.constant 0 : index
      %40 = vector.load %arg8[%c0_22, %c0_23] : memref<8x4864xf32, #tpu.memory_space<vmem>>, vector<8x2432xf32>
      %41 = vector.broadcast %39 : vector<8x1xf32> to vector<8x2432xf32>
      %42 = arith.mulf %40, %41 : vector<8x2432xf32>
      %c0_24 = arith.constant 0 : index
      %c0_25 = arith.constant 0 : index
      %43 = vector.load %arg8[%c0_24, %c0_25] : memref<8x4864xf32, #tpu.memory_space<vmem>>, vector<8x2432xf32>
      tpu.vector_store %arg8[%c0_24, %c0_25], %42 {strides = array<i32>} : memref<8x4864xf32, #tpu.memory_space<vmem>>, vector<8x2432xf32>,
    } else {
    }
    return
  }
  func.func @transform_0(%arg0: i32) -> (i32, i32) {
    %c0_i32 = arith.constant 0 : i32
    %c0_i32_0 = arith.constant 0 : i32
    %c0_i32_1 = arith.constant 0 : i32
    return %c0_i32, %c0_i32_0 : i32, i32
  }
  func.func @transform_1(%arg0: i32) -> (i32, i32) {
    %c0_i32 = arith.constant 0 : i32
    %c0_i32_0 = arith.constant 0 : i32
    %c0_i32_1 = arith.constant 0 : i32
    return %c0_i32, %c0_i32_0 : i32, i32
  }
  func.func @transform_2(%arg0: i32) -> (i32, i32) {
    %c0_i32 = arith.constant 0 : i32
    %c0_i32_0 = arith.constant 0 : i32
    %c0_i32_1 = arith.constant 0 : i32
    return %c0_i32, %c0_i32_0 : i32, i32
  }
  func.func @transform_3(%arg0: i32) -> (i32, i32) {
    %c0_i32 = arith.constant 0 : i32
    %c0_i32_0 = arith.constant 0 : i32
    %c0_i32_1 = arith.constant 0 : i32
    return %c0_i32, %c0_i32_0 : i32, i32
  }
  func.func @transform_4(%arg0: i32) -> (i32, i32) {
    %c0_i32 = arith.constant 0 : i32
    %c0_i32_0 = arith.constant 0 : i32
    %c0_i32_1 = arith.constant 0 : i32
    return %c0_i32, %c0_i32_0 : i32, i32
  }
  func.func @transform_5(%arg0: i32) -> (i32, i32) {
    %c0_i32 = arith.constant 0 : i32
    %c0_i32_0 = arith.constant 0 : i32
    return %c0_i32, %arg0 : i32, i32
  }
  func.func @transform_6(%arg0: i32) -> (i32, i32) {
    %c0_i32 = arith.constant 0 : i32
    %c0_i32_0 = arith.constant 0 : i32
    return %c0_i32, %arg0 : i32, i32
  }
  func.func @transform_7(%arg0: i32) -> (i32, i32) {
    %c0_i32 = arith.constant 0 : i32
    %c0_i32_0 = arith.constant 0 : i32
    %c0_i32_1 = arith.constant 0 : i32
    return %c0_i32, %c0_i32_0 : i32, i32
  }
}

</mosaic_0001>

<bundles_post_ra>
// kernel: tpu_custom_call.1
= control target key start
LH: loop header
LB: loop body
LE: loop exit
PB: predicated region body
PF: predicated region fallthrough
CT: control target
= control target key end

     0   :  { %s4692_s0 = inlined_call_operand.hbm [shape: f32[8,768], index: 0, kind: input, shape index: {}]   ;;  %s4693_s1 = inlined_call_operand.hbm [shape: bf16[768,128], index: 1, kind: input, shape index: {}]   ;;  %s4694_s2 = inlined_call_operand.hbm [shape: f32[1,128], index: 2, kind: input, shape index: {}]   ;;  %s4695_s3 = inlined_call_operand.hbm [shape: bf16[128,128], index: 3, kind: input, shape index: {}]   ;;  %s4696_s4 = inlined_call_operand.hbm [shape: f32[1,128], index: 4, kind: input, shape index: {}]   ;;  %s4697_s5 = inlined_call_operand.hbm [shape: bf16[128,4864], index: 5, kind: input, shape index: {}]   ;;  %s4698_s6 = inlined_call_operand.hbm [shape: f32[1,4864], index: 6, kind: input, shape index: {}]   ;;  %s4699_s7 = inlined_call_operand.hbm [shape: f32[8,4864], index: 7, kind: output, shape index: {}]  }
   0x1   :  { %4709 = sst [smem:[#allocation24_spill]] %s4693_s1 }
   0x2   :  { %4710 = sst [smem:[#allocation25_spill]] %s4695_s3 }
   0x3   :  { %4711 = sst [smem:[#allocation26_spill]] %s4697_s5 }
   0x4   :  { %12 = vsyncpa [#allocation6], 0 }
   0x5   :  { %13 = vsyncpa [#allocation9], 0 }
   0x6   :  { %14 = vsyncpa [#allocation12], 0 }
   0x7   :  { %15 = vsyncpa [#allocation15], 0 }
   0x8   :  { %17 = vsyncpa [#allocation15 + $0x1], 0 }
   0x9   :  { %18 = vsyncpa [#allocation7], 0  ;;  %s4004_s24 = smov 0   ;;  %s4006_s25 = smov 0  }
   0xa   :  { %s4008_s26 = smov 0   ;;  %s4010_s27 = smov 0  }
   0xb LB: > { %s4023_s28 = sadd.s32 4294967295, %s3942_s27   ;;  %p149_p0 = scmp.ne.s32.totalorder %s3934_s25, %s3930_s24  ;;  %s3942_s27 = sphi %s4010_s27, %s4740_s27   ;;  %s3938_s26 = sphi %s4008_s26, %s4739_s26   ;;  %s3934_s25 = sphi %s4006_s25, %s4738_s25   ;;  %s3930_s24 = sphi %s4004_s24, %s4737_s24  }
   0xc   : > { %p4700_p1 = scmp.eq.s32.totalorder %s4023_s28, 0  ;;  %p2864_p2 = scmp.ge.s32.totalorder %s3942_s27, 1 }
   0xd   : > { %p207_p3 = scmp.lt.s32.totalorder %s3942_s27, 3  ;;  %s3944_s8 = smov [#allocation8]  }
   0xe   : > { %p4032_p5 = por %p4700_p1, %p149_p0  ;;  %s230_s9 = sshll.u32 %s3944_s8, 4  ;;  %s231_s9 = int_to_ptr.vmem [resolvable:$true] %s230_s9 }
   0xf   : > { %p4036_p6 = pnand %p2864_p2, %p207_p3  ;;  %s3945_s11 = smov [#allocation11]  }
  0x10   : > { %s4712_s29 = scalar_select %p4032_p5, 1, 0 }
  0x11   : > { %s4713_s30 = scalar_select %p4036_p6, 1, 0 }
  0x12   : > { %p3256_p7 = pneg %p4036_p6  ;;  %s254_s12 = sshll.u32 %s3945_s11, 4  ;;  %s4048_s12 = int_to_ptr.vmem [resolvable:$true] %s254_s12 }
  0x13   : > { %s4715_s1 = sld [smem:[#allocation24_spill]] }
  0x14   : > { %p4044_p8 = pnand %p3256_p7, %p4700_p1 }
  0x16   : > { %s4714_s10 = scalar_select %p4044_p8, 1, 0 }
  0x17   : > { %p4058_p10 = pneg %p4044_p8 }
  0x19   : > { %s3666_s15 = scalar_lea.hbm %s4715_s1, 6144 }
  0x1a   : > { %p3667_p9 = scmp.ne.s32.totalorder %s4715_s1, %s3666_s15  ;;  %p3673_p13 = scmp.lt.u32.totalorder %s3666_s15, %s4715_s1 }
  0x1c   : > { %p3669_p11 = pnand %p4058_p10, %p3667_p9 }
  0x1e   : > { %p3670_p12 = pneg %p3669_p11 }
  0x20   : > { %p3675_p0 = pnand %p3673_p13, %p3670_p12 }
  0x22   : > { %3678 = shalt.err (!%p3675_p0)
}
  0x23   : > { %s3679_s21 = scalar_lea.vmem %s231_s9, 6144  ;;  %p3687_p4 = scmp.lt.s32.totalorder %s231_s9, %s231_s9 }
  0x24   : > { %p3680_p2 = scmp.ne.s32.totalorder %s231_s9, %s3679_s21  ;;  %p3688_p1 = scmp.lt.s32.totalorder %s3679_s21, %s3679_s21 }
  0x26   : > { %p3682_p3 = pnand %p3680_p2, %p4058_p10  ;;  %p3689_p5 = por %p3688_p1, %p3687_p4 }
  0x28   : > { %p3683_p7 = pneg %p3682_p3 }
  0x2a   : > { %p3690_p6 = pnand %p3689_p5, %p3683_p7 }
  0x2c   : > { %3693 = shalt.err (!%p3690_p6)
}
  0x2d   : > { %s3946_s22 = smov 64   ;;  %s3947_s23 = smov 4  }
  0x2e   : > { %3262 = dma.hbm_to_vmem [thread:$0]  (!%p4044_p8), %s4715_s1, 6144, %s231_s9, [#allocation9], %s3946_s22, %s3946_s22, %s3947_s23  }
  0x2f   : > { %s4717_s3 = sld [smem:[#allocation25_spill]] }
  0x35   : > { %s3694_s14 = scalar_lea.hbm %s4717_s3, 1024 }
  0x36   : > { %p3695_p9 = scmp.ne.s32.totalorder %s4717_s3, %s3694_s14  ;;  %p3701_p5 = scmp.lt.u32.totalorder %s3694_s14, %s4717_s3 }
  0x38   : > { %p3697_p1 = pnand %p3695_p9, %p4058_p10 }
  0x3a   : > { %p3698_p4 = pneg %p3697_p1 }
  0x3c   : > { %p3703_p6 = pnand %p3701_p5, %p3698_p4 }
  0x3e   : > { %3706 = shalt.err (!%p3703_p6)
}
  0x3f   : > { %s3707_s9 = scalar_lea.vmem %s4048_s12, 1024  ;;  %p3715_p0 = scmp.lt.s32.totalorder %s4048_s12, %s4048_s12 }
  0x40   : > { %p3708_p11 = scmp.ne.s32.totalorder %s4048_s12, %s3707_s9  ;;  %p3716_p2 = scmp.lt.s32.totalorder %s3707_s9, %s3707_s9 }
  0x42   : > { %p3710_p12 = pnand %p3708_p11, %p4058_p10  ;;  %p3717_p3 = por %p3716_p2, %p3715_p0 }
  0x44   : > { %p3711_p13 = pneg %p3710_p12 }
  0x46   : > { %p3718_p7 = pnand %p3717_p3, %p3711_p13 }
  0x48   : > { %3721 = shalt.err (!%p3718_p7)
}
  0x49   : > { %3268 = dma.hbm_to_vmem [thread:$0]  (!%p4044_p8), %s4717_s3, 1024, %s4048_s12, [#allocation12], %s3946_s22, %s3946_s22, %s3947_s23  }
  0x4a   : > { %s4098_s24 = sadd.s32 1, %s3942_s27   ;;  %s136_s8 = sadd.s32 1, %s3938_s26 }
  0x4b   : > { %s133_s11 = ssub.s32 %s3942_s27, %s4098_s24  ;;  %p143_p9 = scmp.ne.s32.totalorder %s3938_s26, %s3934_s25 }
  0x4c   : > { %p134_p1 = scmp.eq.s32.totalorder %s133_s11, 0  ;;  %p144_p4 = scmp.eq.s32.totalorder %s3942_s27, 0 }
  0x4d   : > { %p3284_p5 = scmp.lt.s32.totalorder %s3942_s27, 2  ;;  %s279_s13 = sand.u32 1, %s3942_s27  }
  0x4e   : > { %s4109_s14 = scalar_select %p134_p1, %s3938_s26, %s136_s8  }
  0x4f   : > { %p145_p6 = por %p144_p4, %p143_p9  ;;  %s4703_s15 = sand.u32 1, %s3938_s26  }
  0x50   : > { %4718 = sst [smem:[#allocation23_spill]] %s4109_s14  ;;  %s3098_s16 = smul.u32 1216, %s3942_s27 }
  0x51   : > { %s3224_s17 = smul.u32 1216, %s4703_s15  ;;  %p4115_p11 = pnand %p3284_p5, %p145_p6 }
  0x52   : > { %s4720_s5 = sld [smem:[#allocation26_spill]]  ;;  %s4126_s21 = scalar_lea.sflag [#allocation15], %s279_s13 }
  0x53   : > { %s4719_s19 = scalar_select %p4115_p11, 1, 0 }
  0x54   : > { %s283_s9 = scalar_lea.vmem [#allocation14], %s3224_s17  ;;  %p4706_p13 = pneg %p4115_p11 }
  0x55   : > { %s290_s20 = sshll.u32 %s283_s9, 4  ;;  %s4124_s20 = int_to_ptr.vmem [resolvable:$true] %s290_s20 }
  0x58   : > { %s4122_s23 = scalar_lea.hbm %s4720_s5, %s3098_s16  ;;  %s3727_s12 = scalar_lea.hbm %s4720_s5, 38912 }
  0x59   : > { %s3722_s8 = scalar_lea.hbm %s4122_s23, 19456  ;;  %p3728_p3 = scmp.lt.u32.totalorder %s4122_s23, %s4720_s5 }
  0x5a   : > { %p3723_p12 = scmp.ne.s32.totalorder %s4122_s23, %s3722_s8  ;;  %p3729_p7 = scmp.lt.u32.totalorder %s3727_s12, %s3722_s8 }
  0x5b   : > { %p3731_p1 = scmp.lt.u32.totalorder %s3722_s8, %s4122_s23 }
  0x5c   : > { %p3725_p0 = pnand %p4706_p13, %p3723_p12  ;;  %p3730_p9 = por %p3729_p7, %p3728_p3 }
  0x5e   : > { %p3726_p2 = pneg %p3725_p0  ;;  %p3732_p4 = por %p3731_p1, %p3730_p9 }
  0x60   : > { %p3733_p5 = pnand %p3732_p4, %p3726_p2 }
  0x62   : > { %3736 = shalt.err (!%p3733_p5)
}
  0x63   : > { %s3737_s13 = scalar_lea.vmem %s4124_s20, 19456  ;;  %s3948_s17 = smov [#allocation14]  }
  0x64   : > { %p3738_p6 = scmp.ne.s32.totalorder %s4124_s20, %s3737_s13  ;;  %s3742_s9 = sshll.u32 %s3948_s17, 4  ;;  %s3743_s9 = int_to_ptr.vmem [resolvable:$false] %s3742_s9 }
  0x65   : > { %s3744_s15 = scalar_lea.vmem %s3743_s9, 38912  ;;  %p3745_p8 = scmp.lt.s32.totalorder %s4124_s20, %s3743_s9 }
  0x66   : > { %p3740_p12 = pnand %p3738_p6, %p4706_p13  ;;  %p3746_p3 = scmp.lt.s32.totalorder %s3744_s15, %s3737_s13 }
  0x68   : > { %p3741_p0 = pneg %p3740_p12  ;;  %p3747_p7 = por %p3746_p3, %p3745_p8 }
  0x6a   : > { %p3748_p9 = pnand %p3747_p7, %p3741_p0 }
  0x6c   : > { %3751 = shalt.err (!%p3748_p9)
}
  0x6d   : > { %s3949_s8 = smov 2432   ;;  %s3950_s11 = smov 1216  }
  0x6e   : > { %s3951_s16 = smov 76   ;;  %s3952_s12 = smov [#allocation5]  }
  0x6f   : > { %3275 = dma.hbm_to_vmem [thread:$0]  (!%p4115_p11), %s4122_s23, 19456, %s4124_s20, %s4126_s21, %s3949_s8, %s3950_s11, %s3951_s16  }
  0x70   : > { %s220_s22 = sshll.u32 %s3952_s12, 4  ;;  %s3953_s17 = smov [#allocation10]   ;;  %s221_s22 = int_to_ptr.vmem [resolvable:$true] %s220_s22 }
  0x71   : > { %s244_s1 = sshll.u32 %s3953_s17, 4  ;;  %s3752_s15 = scalar_lea.hbm %s4692_s0, 768  ;;  %s4154_s1 = int_to_ptr.vmem [resolvable:$true] %s244_s1 }
  0x72   : > { %p3753_p8 = scmp.ne.s32.totalorder %s4692_s0, %s3752_s15  ;;  %p3759_p4 = scmp.lt.u32.totalorder %s3752_s15, %s4692_s0 }
  0x74   : > { %p3755_p2 = pnand %p3753_p8, %p4058_p10 }
  0x76   : > { %p3756_p1 = pneg %p3755_p2 }
  0x78   : > { %p3761_p5 = pnand %p3759_p4, %p3756_p1 }
  0x7a   : > { %3764 = shalt.err (!%p3761_p5)
}
  0x7b   : > { %s3765_s20 = scalar_lea.vmem %s221_s22, 768  ;;  %p3773_p3 = scmp.lt.s32.totalorder %s221_s22, %s221_s22 }
  0x7c   : > { %p3766_p6 = scmp.ne.s32.totalorder %s221_s22, %s3765_s20  ;;  %p3774_p7 = scmp.lt.s32.totalorder %s3765_s20, %s3765_s20 }
  0x7e   : > { %p3768_p12 = pnand %p3766_p6, %p4058_p10  ;;  %p3775_p9 = por %p3774_p7, %p3773_p3 }
  0x80   : > { %p3769_p0 = pneg %p3768_p12 }
  0x82   : > { %p3776_p13 = pnand %p3775_p9, %p3769_p0 }
  0x84   : > { %3779 = shalt.err (!%p3776_p13)
}
  0x85   : > { %p4721_p8 = scmp.ne.s32.totalorder %s4714_s10, 0  ;;  %s3780_s11 = scalar_lea.hbm %s4694_s2, 16 }
  0x86   : > { %p3781_p2 = scmp.ne.s32.totalorder %s4694_s2, %s3780_s11  ;;  %p3787_p13 = scmp.lt.u32.totalorder %s3780_s11, %s4694_s2 }
  0x87   : > { %3259 = dma.hbm_to_vmem [thread:$0]  (!%p4721_p8), %s4692_s0, 768, %s221_s22, [#allocation6]  }
  0x88   : > { %p3783_p1 = pnand %p3781_p2, %p4058_p10 }
  0x8a   : > { %p3784_p4 = pneg %p3783_p1 }
  0x8c   : > { %p3789_p5 = pnand %p3787_p13, %p3784_p4 }
  0x8e   : > { %3792 = shalt.err (!%p3789_p5)
}
  0x8f   : > { %s3793_s22 = scalar_lea.vmem %s4154_s1, 16  ;;  %s3800_s9 = scalar_lea.vmem %s4154_s1, 32 }
  0x90   : > { %p3794_p6 = scmp.ne.s32.totalorder %s4154_s1, %s3793_s22  ;;  %p3801_p3 = scmp.lt.s32.totalorder %s4154_s1, %s4154_s1 }
  0x91   : > { %p3802_p7 = scmp.lt.s32.totalorder %s3800_s9, %s3793_s22 }
  0x92   : > { %p3796_p12 = pnand %p3794_p6, %p4058_p10 }
  0x93   : > { %p3803_p9 = por %p3802_p7, %p3801_p3 }
  0x94   : > { %p3797_p0 = pneg %p3796_p12 }
  0x96   : > { %p3804_p2 = pnand %p3803_p9, %p3797_p0 }
  0x98   : > { %3807 = shalt.err (!%p3804_p2)
}
  0x99   : > { %3265 = dma.hbm_to_vmem [thread:$0]  (!%p4721_p8), %s4694_s2, 16, %s4154_s1, [#allocation9]  }
  0x9a   : > { %s4722_s20 = sand.u32 1, %s3938_s26   ;;  %s3954_s5 = smov [#allocation13]  }
  0x9b   : > { %s3225_s3 = smul.u32 19, %s4722_s20  ;;  %s268_s14 = sshll.u32 %s3954_s5, 4  ;;  %s269_s14 = int_to_ptr.vmem [resolvable:$true] %s268_s14 }
  0x9c   : > { %s3099_s8 = smul.u32 304, %s3942_s27  ;;  %s3808_s12 = scalar_lea.hbm %s4696_s4, 16 }
  0x9d   : > { %p3809_p1 = scmp.ne.s32.totalorder %s4696_s4, %s3808_s12  ;;  %p3815_p5 = scmp.lt.u32.totalorder %s3808_s12, %s4696_s4 }
  0x9f   : > { %p3811_p4 = pnand %p3809_p1, %p4058_p10 }
  0xa1   : > { %p3812_p13 = pneg %p3811_p4 }
  0xa3   : > { %p3817_p6 = pnand %p3815_p5, %p3812_p13 }
  0xa5   : > { %3820 = shalt.err (!%p3817_p6)
}
  0xa6   : > { %s3821_s1 = scalar_lea.vmem %s269_s14, 16  ;;  %s3828_s27 = scalar_lea.vmem %s269_s14, 32 }
  0xa7   : > { %p3822_p12 = scmp.ne.s32.totalorder %s269_s14, %s3821_s1  ;;  %p3829_p7 = scmp.lt.s32.totalorder %s269_s14, %s269_s14 }
  0xa8   : > { %p3830_p9 = scmp.lt.s32.totalorder %s3828_s27, %s3821_s1 }
  0xa9   : > { %p3824_p0 = pnand %p3822_p12, %p4058_p10 }
  0xaa   : > { %p3831_p2 = por %p3830_p9, %p3829_p7 }
  0xab   : > { %p3825_p3 = pneg %p3824_p0 }
  0xad   : > { %p3832_p11 = pnand %p3831_p2, %p3825_p3 }
  0xaf   : > { %3835 = shalt.err (!%p3832_p11)
}
  0xb0   : > { %3271 = dma.hbm_to_vmem [thread:$0]  (!%p4721_p8), %s4696_s4, 16, %s269_s14, [#allocation12]  }
  0xb1   : > { %s4222_s11 = scalar_lea.hbm %s4698_s6, %s3099_s8  ;;  %s304_s18 = scalar_lea.vmem [#allocation16], %s3225_s3 }
  0xb2   : > { %s312_s16 = sshll.u32 %s304_s18, 4  ;;  %s3836_s12 = scalar_lea.hbm %s4222_s11, 304  ;;  %s313_s16 = int_to_ptr.vmem [resolvable:$true] %s312_s16 }
  0xb3   : > { %p3837_p10 = scmp.ne.s32.totalorder %s4222_s11, %s3836_s12  ;;  %p4723_p11 = scmp.ne.s32.totalorder %s4719_s19, 0 }
  0xb4   : > { %s3841_s17 = scalar_lea.hbm %s4698_s6, 608  ;;  %p3842_p8 = scmp.lt.u32.totalorder %s4222_s11, %s4698_s6 }
  0xb5   : > { %p4724_p1 = pneg %p4723_p11  ;;  %p3843_p5 = scmp.lt.u32.totalorder %s3841_s17, %s3836_s12 }
  0xb6   : > { %p3845_p12 = scmp.lt.u32.totalorder %s3836_s12, %s4222_s11 }
  0xb7   : > { %p3839_p4 = pnand %p3837_p10, %p4724_p1  ;;  %p3844_p6 = por %p3843_p5, %p3842_p8 }
  0xb9   : > { %p3840_p13 = pneg %p3839_p4  ;;  %p3846_p0 = por %p3845_p12, %p3844_p6 }
  0xbb   : > { %p3847_p3 = pnand %p3846_p0, %p3840_p13 }
  0xbd   : > { %3850 = shalt.err (!%p3847_p3)
}
  0xbe   : > { %s3851_s3 = scalar_lea.vmem %s313_s16, 304  ;;  %p4725_p9 = pmov %p4724_p1 }
  0xbf   : > { %p3852_p7 = scmp.ne.s32.totalorder %s313_s16, %s3851_s3  ;;  %s3955_s22 = smov [#allocation16]  }
  0xc0   : > { %s3856_s9 = sshll.u32 %s3955_s22, 4  ;;  %s3857_s9 = int_to_ptr.vmem [resolvable:$false] %s3856_s9 }
  0xc1   : > { %p3854_p2 = pnand %p3852_p7, %p4725_p9  ;;  %s3858_s1 = scalar_lea.vmem %s3857_s9, 608 }
  0xc2   : > { %p3859_p1 = scmp.lt.s32.totalorder %s313_s16, %s3857_s9  ;;  %p3860_p4 = scmp.lt.s32.totalorder %s3858_s1, %s3851_s3 }
  0xc3   : > { %p3855_p10 = pneg %p3854_p2 }
  0xc4   : > { %p3861_p5 = por %p3860_p4, %p3859_p1 }
  0xc6   : > { %p3862_p8 = pnand %p3861_p5, %p3855_p10 }
  0xc8   : > { %3865 = shalt.err (!%p3862_p8)
}
  0xc9   : > { %3278 = dma.hbm_to_vmem [thread:$0]  (!%p4723_p11), %s4222_s11, 304, %s313_s16, %s4126_s21  }
  0xca   : > { %p4726_p13 = scmp.ne.s32.totalorder %s4713_s30, 0 }
  0xcb   : > { %p4727_p6 = scmp.eq.s32.totalorder (!%p4726_p13), %s4023_s28, 0 }
  0xcc   : > { %321 = sbr.rel (%p4726_p13) target bundleno = 1783 (0x6f7), region = 48 }
  0xd3   : > { %3909 = dma.done.wait (%p4727_p6), [#allocation6], 768   ;;  %p4728_p12 = pmov %p4727_p6 }
  0xd4   : > { %p4729_p0 = pmov %p4727_p6 }
  0xd5   : > { %3911 = vsyncadd (%p4728_p12), [#allocation6], 4294966528 }
  0xd6   : > { %3913 = dma.done.wait (%p4729_p0), [#allocation9], 6160   ;;  %p4730_p3 = pmov %p4729_p0 }
  0xd7   : > { %p4731_p7 = pmov %p4729_p0 }
  0xd8   : > { %3915 = vsyncadd (%p4730_p3), [#allocation9], 4294961136 }
  0xd9   : > { %3917 = dma.done.wait (%p4731_p7), [#allocation12], 1040   ;;  %p4732_p11 = pmov %p4729_p0 }
  0xda   : > { %s343_s30 = sand.u32 1, %s4023_s28   ;;  %s345_s19 = sand.u32 1, %s3934_s25  }
  0xdb   : > { %3919 = vsyncadd (%p4732_p11), [#allocation12], 4294966256  ;;  %s3226_s21 = smul.u32 1216, %s345_s19  ;;  %s344_s27 = scalar_lea.sflag [#allocation15], %s343_s30 }
  0xdc   : > { %p4733_p9 = scmp.ne.s32.totalorder %s4712_s29, 0 }
  0xdd   : > { %s4260_s15 = scalar_lea.vmem [#allocation14], %s3226_s21 }
  0xde   : > { %3921 = dma.done.wait (%p4733_p9), %s344_s27, 19760  }
  0xdf   : > { %3923 = vsyncadd (%p4733_p9), %s344_s27, 4294947536  ;;  %s3227_s23 = smul.u32 19, %s345_s19  ;;  %p4734_p2 = scmp.ne.s32.totalorder %s4023_s28, 0 }
  0xe0   : > { %v3342_v0 = vld [vmem:[#allocation8 + $0x40] sm:$0xff] (!%p4734_p2)   ;;  %v3346_v4 = vld [vmem:[#allocation8 + $0x48] sm:$0xff] (!%p4734_p2)   ;;  %v3350_v8 = vld [vmem:[#allocation8 + $0x50] sm:$0xff] (!%p4734_p2)   ;;  %vm1033_vm0 = vcmask (!%p4734_p2), 7168   ;;  %v3956_v61 = vmov (!%p4734_p2), 0.0   ;;  %v3957_v62 = vmov (!%p4734_p2), -inf  }
  0xe1   : > { %s4266_s20 = scalar_lea.vmem [#allocation16], %s3227_s23  ;;  %393 = sbr.rel (%p4734_p2) target bundleno = 729 (0x2d9), region = 80  ;;  %v3343_v1 = vld [vmem:[#allocation8] sm:$0xff] (!%p4734_p2)   ;;  %3100 = vmatprep.subr.bf16.mxu0 (!%p4734_p2), %v3342_v0  ;;  %v3347_v5 = vld [vmem:[#allocation8 + $0x8] sm:$0xff] (!%p4734_p2)   ;;  %v3351_v9 = vld [vmem:[#allocation8 + $0x10] sm:$0xff] (!%p4734_p2)   ;;  %1034 = vst.msk [vmem:[#allocation3] sm:$0xff] (!%p4734_p2), %vm1033_vm0, %v3957_v62 }
  0xe2   : > { %v3344_v2 = vld [vmem:[#allocation8 + $0xc0] sm:$0xff] (!%p4734_p2)   ;;  %3101 = vmatpush3.bf16.msra.mxu0 (!%p4734_p2), %v3343_v1  ;;  %v3348_v6 = vld [vmem:[#allocation8 + $0xc8] sm:$0xff] (!%p4734_p2)   ;;  %v3352_v10 = vld [vmem:[#allocation8 + $0xd0] sm:$0xff] (!%p4734_p2)   ;;  %1035 = vst.msk [vmem:[#allocation4] sm:$0xff] (!%p4734_p2), %vm1033_vm0, %v3956_v61  ;;  %vm3958_vm1 = vmmov (!%p4734_p2), 0  }
  0xe3   : > { %v3345_v3 = vld [vmem:[#allocation8 + $0x80] sm:$0xff] (!%p4734_p2)   ;;  %3122 = vmatprep.subr.bf16.mxu1 (!%p4734_p2), %v3344_v2  ;;  %3102 = vmatprep.subr.bf16.mxu0 (!%p4734_p2), %v3346_v4  ;;  %v3349_v7 = vld [vmem:[#allocation8 + $0x88] sm:$0xff] (!%p4734_p2)   ;;  %v3353_v11 = vld [vmem:[#allocation8 + $0x90] sm:$0xff] (!%p4734_p2)  }
  0xe4   : > { %3123 = vmatpush3.bf16.msra.mxu1 (!%p4734_p2), %v3345_v3  ;;  %v3354_v12 = vld [vmem:[#allocation8 + $0x58] sm:$0xff] (!%p4734_p2)   ;;  %v3358_v16 = vld [vmem:[#allocation8 + $0x60] sm:$0xff] (!%p4734_p2)   ;;  %v3362_v20 = vld [vmem:[#allocation8 + $0x68] sm:$0xff] (!%p4734_p2)  }
  0xe5   : > { %3124 = vmatprep.subr.bf16.mxu1 (!%p4734_p2), %v3348_v6  ;;  %v3355_v13 = vld [vmem:[#allocation8 + $0x18] sm:$0xff] (!%p4734_p2)   ;;  %v3359_v17 = vld [vmem:[#allocation8 + $0x20] sm:$0xff] (!%p4734_p2)   ;;  %v3363_v21 = vld [vmem:[#allocation8 + $0x28] sm:$0xff] (!%p4734_p2)  }
  0xe6   : > { %3103 = vmatpush3.bf16.msra.mxu0 (!%p4734_p2), %v3347_v5  ;;  %v3356_v14 = vld [vmem:[#allocation8 + $0xd8] sm:$0xff] (!%p4734_p2)   ;;  %v3360_v18 = vld [vmem:[#allocation8 + $0xe0] sm:$0xff] (!%p4734_p2)   ;;  %v3364_v22 = vld [vmem:[#allocation8 + $0xe8] sm:$0xff] (!%p4734_p2)  }
  0xe7   : > { %3104 = vmatprep.subr.bf16.mxu0 (!%p4734_p2), %v3350_v8  ;;  %v3357_v15 = vld [vmem:[#allocation8 + $0x98] sm:$0xff] (!%p4734_p2)   ;;  %v3361_v19 = vld [vmem:[#allocation8 + $0xa0] sm:$0xff] (!%p4734_p2)   ;;  %v3365_v23 = vld [vmem:[#allocation8 + $0xa8] sm:$0xff] (!%p4734_p2)  }
  0xe8   : > { %3125 = vmatpush3.bf16.msra.mxu1 %v3349_v7  ;;  %v3366_v24 = vld [vmem:[#allocation8 + $0x70] sm:$0xff]   ;;  %v3370_v28 = vld [vmem:[#allocation8 + $0x78] sm:$0xff]   ;;  %v3374_v36 = vld [vmem:[#allocation8 + $0x140] sm:$0xff]  }
  0xe9   : > { %3126 = vmatprep.subr.bf16.mxu1 %v3352_v10  ;;  %v3367_v25 = vld [vmem:[#allocation8 + $0x30] sm:$0xff]   ;;  %v3371_v29 = vld [vmem:[#allocation8 + $0x38] sm:$0xff]   ;;  %v397_v37 = vld [vmem:[#allocation5 + $0x18] sm:$0xff] }
  0xea   : > { %3105 = vmatpush3.bf16.msra.mxu0 %v3351_v9  ;;  %v3368_v26 = vld [vmem:[#allocation8 + $0xf0] sm:$0xff]   ;;  %v3372_v30 = vld [vmem:[#allocation8 + $0xf8] sm:$0xff]   ;;  %v403_v38 = vpack.c.bf16 %v397_v37, %v397_v37  ;;  %v3375_v39 = vld [vmem:[#allocation8 + $0x100] sm:$0xff]  }
  0xeb   : > { %3106 = vmatprep.subr.bf16.mxu0 %v3354_v12  ;;  %v3369_v27 = vld [vmem:[#allocation8 + $0xb0] sm:$0xff]   ;;  %v395_v31 = vld [vmem:[#allocation5 + $0x8] sm:$0xff]  ;;  %v396_v40 = vld [vmem:[#allocation5 + $0x10] sm:$0xff] }
  0xec   : > { %3127 = vmatpush3.bf16.msra.mxu1 %v3353_v11  ;;  %v401_v32 = vpack.c.bf16 %v395_v31, %v395_v31  ;;  %v3373_v33 = vld [vmem:[#allocation8 + $0xb8] sm:$0xff]   ;;  %v394_v34 = vld [vmem:[#allocation5] sm:$0xff]  ;;  %869 = vmatprep.mubr.bf16.mxu1 %v403_v38  ;;  %v402_v41 = vpack.c.bf16 %v396_v40, %v396_v40  ;;  %v3376_v42 = vld [vmem:[#allocation8 + $0x148] sm:$0xff]  }
  0xed   : > { %3128 = vmatprep.subr.bf16.mxu1 %v3356_v14  ;;  %v400_v35 = vpack.c.bf16 %v394_v34, %v394_v34  ;;  %v3377_v43 = vld [vmem:[#allocation8 + $0x108] sm:$0xff]   ;;  %v3378_v44 = vld [vmem:[#allocation8 + $0x150] sm:$0xff]   ;;  %v3380_v46 = vld [vmem:[#allocation8 + $0x158] sm:$0xff]  }
  0xee   : > { %3107 = vmatpush3.bf16.msra.mxu0 %v3355_v13  ;;  %829 = vmatprep.mubr.bf16.mxu0 %v401_v32  ;;  %v3379_v45 = vld [vmem:[#allocation8 + $0x110] sm:$0xff]   ;;  %v3381_v47 = vld [vmem:[#allocation8 + $0x118] sm:$0xff]   ;;  %v3382_v48 = vld [vmem:[#allocation8 + $0x160] sm:$0xff]  }
  0xef   : > { %3108 = vmatprep.subr.bf16.mxu0 %v3358_v16  ;;  %v3383_v49 = vld [vmem:[#allocation8 + $0x120] sm:$0xff]   ;;  %v3384_v50 = vld [vmem:[#allocation8 + $0x168] sm:$0xff]   ;;  %v399_v51 = vld [vmem:[#allocation5 + $0x28] sm:$0xff] }
  0xf0   : > { %3129 = vmatpush3.bf16.msra.mxu1 %v3357_v15  ;;  %v3385_v52 = vld [vmem:[#allocation8 + $0x128] sm:$0xff]   ;;  %v405_v53 = vpack.c.bf16 %v399_v51, %v399_v51  ;;  %v3386_v54 = vld [vmem:[#allocation8 + $0x170] sm:$0xff]   ;;  %v3388_v56 = vld [vmem:[#allocation8 + $0x178] sm:$0xff]  }
  0xf1   : > { %3130 = vmatprep.subr.bf16.mxu1 %v3360_v18  ;;  %v3387_v55 = vld [vmem:[#allocation8 + $0x130] sm:$0xff]   ;;  %v3389_v57 = vld [vmem:[#allocation8 + $0x138] sm:$0xff]   ;;  %v3390_v60 = vld [vmem:[#allocation11] sm:$0xff]  }
  0xf2   : > { %3109 = vmatpush3.bf16.msra.mxu0 %v3359_v17  ;;  %v398_v58 = vld [vmem:[#allocation5 + $0x20] sm:$0xff]  ;;  %v3393_v1 = vld [vmem:[#allocation11 + $0x18] sm:$0xff]   ;;  %v3394_v2 = vld [vmem:[#allocation11 + $0x20] sm:$0xff]  }
  0xf3   : > { %3110 = vmatprep.subr.bf16.mxu0 %v3362_v20  ;;  %v404_v59 = vpack.c.bf16 %v398_v58, %v398_v58  ;;  %v3391_v63 = vld [vmem:[#allocation11 + $0x8] sm:$0xff]   ;;  %v3392_v0 = vld [vmem:[#allocation11 + $0x10] sm:$0xff]   ;;  %v3397_v5 = vld [vmem:[#allocation11 + $0x38] sm:$0xff]  }
  0xf4   : > { %3131 = vmatpush3.bf16.msra.mxu1 %v3361_v19  ;;  %v3395_v3 = vld [vmem:[#allocation11 + $0x28] sm:$0xff]   ;;  %v3396_v4 = vld [vmem:[#allocation11 + $0x30] sm:$0xff]   ;;  %v2880_v7 = vld [vmem:[#allocation10] ss:$0 sm:$0xff] }
  0xf5   : > { %3132 = vmatprep.subr.bf16.mxu1 %v3364_v22 }
  0xf6   : > { %3111 = vmatpush3.bf16.msra.mxu0 %v3363_v21 }
  0xf7   : > { %3112 = vmatprep.subr.bf16.mxu0 %v3366_v24 }
  0xf8   : > { %3133 = vmatpush3.bf16.msra.mxu1 %v3365_v23 }
  0xf9   : > { %3134 = vmatprep.subr.bf16.mxu1 %v3368_v26 }
  0xfa   : > { %3113 = vmatpush3.bf16.msra.mxu0 %v3367_v25 }
  0xfb   : > { %3114 = vmatprep.subr.bf16.mxu0 %v3370_v28 }
  0xfc   : > { %3135 = vmatpush3.bf16.msra.mxu1 %v3369_v27  ;;  %v2929_v27 = vld [vmem:[#allocation13] ss:$0 sm:$0xff] }
  0xfd   : > { %3136 = vmatprep.subr.bf16.mxu1 %v3372_v30 }
  0xfe   : > { %3115 = vmatpush3.bf16.msra.mxu0 %v3371_v29 }
  0xff   : > { %3144 = vmatprep.subr.bf16.mxu0 %v3374_v36 }
 0x100   : > { %3137 = vmatpush3.bf16.msra.mxu1 %v3373_v33 }
 0x101   : > { %830 = vmatmul.mubr.bf16.vlgmr.msra.gmra.mrb[0].mxu0 %v400_v35  ;;  %3184 = vmatprep.subr.bf16.mxu1 %v3956_v61 }
 0x102   : > { %3145 = vmatpush3.bf16.msra.mxu0 %v3375_v39  ;;  %909 = vmatprep.mubr.bf16.mxu0 %v405_v53 }
 0x103   : > { %870 = vmatmul.mubr.bf16.vlgmr.msra.gmra.mrb[0].mxu1 %v402_v41  ;;  %3146 = vmatprep.subr.bf16.mxu0 %v3376_v42 }
 0x104   : > { %3185 = vmatpush3.bf16.msra.mxu1 %v3390_v60  ;;  %3200 = vmatprep.mubr.msk.bf16.mxu1 %vm3958_vm1, %v3956_v61 }
 0x105   : > { %3186 = vmatprep.subr.bf16.mxu1 %v3956_v61 }
 0x106   : > { %3147 = vmatpush3.bf16.msra.mxu0 %v3377_v43 }
 0x107   : > { %3148 = vmatprep.subr.bf16.mxu0 %v3378_v44 }
 0x108   : > { %3187 = vmatpush3.bf16.msra.mxu1 %v3391_v63 }
 0x109   : > { %3188 = vmatprep.subr.bf16.mxu1 %v3956_v61 }
 0x10a   : > { %3149 = vmatpush3.bf16.msra.mxu0 %v3379_v45 }
 0x10b   : > { %3150 = vmatprep.subr.bf16.mxu0 %v3380_v46 }
 0x10c   : > { %3189 = vmatpush3.bf16.msra.mxu1 %v3392_v0 }
 0x10d   : > { %3190 = vmatprep.subr.bf16.mxu1 %v3956_v61 }
 0x10e   : > { %3151 = vmatpush3.bf16.msra.mxu0 %v3381_v47 }
 0x10f   : > { %3152 = vmatprep.subr.bf16.mxu0 %v3382_v48 }
 0x110   : > { %3191 = vmatpush3.bf16.msra.mxu1 %v3393_v1 }
 0x111   : > { %3192 = vmatprep.subr.bf16.mxu1 %v3956_v61 }
 0x112   : > { %3153 = vmatpush3.bf16.msra.mxu0 %v3383_v49 }
 0x113   : > { %3154 = vmatprep.subr.bf16.mxu0 %v3384_v50 }
 0x114   : > { %3193 = vmatpush3.bf16.msra.mxu1 %v3394_v2 }
 0x115   : > { %3194 = vmatprep.subr.bf16.mxu1 %v3956_v61 }
 0x116   : > { %3155 = vmatpush3.bf16.msra.mxu0 %v3385_v52 }
 0x117   : > { %3156 = vmatprep.subr.bf16.mxu0 %v3386_v54 }
 0x118   : > { %3195 = vmatpush3.bf16.msra.mxu1 %v3395_v3 }
 0x119   : > { %3196 = vmatprep.subr.bf16.mxu1 %v3956_v61 }
 0x11a   : > { %3157 = vmatpush3.bf16.msra.mxu0 %v3387_v55 }
 0x11b   : > { %3158 = vmatprep.subr.bf16.mxu0 %v3388_v56 }
 0x11c   : > { %3197 = vmatpush3.bf16.msra.mxu1 %v3396_v4 }
 0x11d   : > { %3198 = vmatprep.subr.bf16.mxu1 %v3956_v61 }
 0x11e   : > { %3159 = vmatpush3.bf16.msra.mxu0 %v3389_v57 }
 0x120   : > { %3199 = vmatpush3.bf16.msra.mxu1 %v3397_v5 }
 0x121   : > { %910 = vmatmul.mubr.bf16.vlgmr.msra.gmra.mrb[4].mxu0 %v404_v59 }
 0x1d4   : > { %v3116_v6 = vpop.f32.mrb[0].mxu0 }
 0x1d5   : > { %v3117_v8 = vpop.f32.mrb[1].mxu0 }
 0x1d6   : > { %v3118_v9 = vadd.f32 %v3117_v8, %v3116_v6  ;;  %v3119_v10 = vpop.f32.mrb[2].mxu0  ;;  %v3138_v11 = vpop.f32.mrb[0].mxu1 }
 0x1d7   : > { %v3120_v12 = vpop.f32.mrb[3].mxu0  ;;  %v3139_v14 = vpop.f32.mrb[1].mxu1 }
 0x1d8   : > { %v832_v13 = vadd.f32 %v3118_v9, %v2880_v7  ;;  %v3140_v15 = vadd.f32 %v3139_v14, %v3138_v11  ;;  %v3141_v16 = vpop.f32.mrb[2].mxu1 }
 0x1d9   : > { %v3142_v17 = vpop.f32.mrb[3].mxu1 }
 0x1da   : > { %v872_v18 = vadd.f32 %v3140_v15, %v832_v13 }
 0x1f4   : > { %v3160_v19 = vpop.f32.mrb[4].mxu0 }
 0x1f5   : > { %v3161_v20 = vpop.f32.mrb[5].mxu0 }
 0x1f6   : > { %v3162_v21 = vadd.f32 %v3161_v20, %v3160_v19  ;;  %v3163_v22 = vpop.f32.mrb[6].mxu0 }
 0x1f7   : > { %v3164_v23 = vpop.f32.mrb[7].mxu0 }
 0x1f8   : > { %v912_v24 = vadd.f32 %v3162_v21, %v872_v18 }
 0x1fa   : > { %v917_v25 = vmax.f32 %v912_v24, 0.0 }
 0x1fc   : > { %v918_v26 = vpack.c.bf16 %v917_v25, %v917_v25 }
 0x1fe   : > { %3201 = vmatmul.mubr.bf16.vlgmr.msra.gmra.mrb[4].mxu1 %v918_v26 }
 0x2d1   : > { %v1024_v28 = vpop.f32.mrb[4].mxu1 }
 0x2d2   : > { %v1025_v29 = vadd.f32 %v2929_v27, %v1024_v28  ;;  %v3202_v30 = vpop.f32.mrb[5].mxu1 }
 0x2d3   : > { %v1027_v31 = vpop.f32.mrb[6].mxu1 }
 0x2d4   : > { %v1030_v32 = vmax.f32 %v1025_v29, 0.0  ;;  %v3203_v33 = vpop.f32.mrb[7].mxu1 }
 0x2d6   : > { %v1031_v34 = vpack.c.bf16 %v1030_v32, %v1030_v32 }
 0x2d8   : > { %1032 = vst [vmem:[#allocation2] sm:$0xf] %v1031_v34 }
 0x2d9 PF: > { %v3399_v35 = vld [vmem:[%s4260_s15 + $0x4] ss:$76 sps:$4 sm:$0xff]   ;;  %v3401_v36 = vld [vmem:[%s4260_s15 + $0xc] ss:$76 sps:$4 sm:$0xff]   ;;  %v3959_v37 = vmov 0   ;;  %vm3961_vm2 = vmmov 0  }
 0x2da   : > { %2098 = vmatprep.mubr.bf16.mxu0 %v3959_v37  ;;  %2139 = vmatprep.mubr.bf16.mxu1 %v3959_v37  ;;  %v3403_v38 = vld [vmem:[%s4260_s15] ss:$76 sps:$4 sm:$0xff]   ;;  %v3404_v39 = vld [vmem:[%s4260_s15 + $0x8] ss:$76 sps:$4 sm:$0xff]   ;;  %v3407_v41 = vld [vmem:[%s4260_s15 + $0xa4] ss:$76 sps:$4 sm:$0xff]  }
 0x2db   : > { %2066 = vmatprep.subr.bf16.mxu0 %v3399_v35  ;;  %3398 = vset.pattern.permute.xlu0 %v3959_v37  ;;  %v3405_v40 = vld [vmem:[%s4260_s15 + $0x9c] ss:$76 sps:$4 sm:$0xff]   ;;  %v3409_v42 = vld [vmem:[%s4260_s15 + $0x98] ss:$76 sps:$4 sm:$0xff]   ;;  %v3410_v43 = vld [vmem:[%s4260_s15 + $0xa0] ss:$76 sps:$4 sm:$0xff]  }
 0x2dc   : > { %2107 = vmatprep.subr.bf16.mxu1 %v3401_v36  ;;  %2067 = vmatpush1.bf16.msra.mxu0 %v3403_v38  ;;  %v3411_v44 = vld [vmem:[%s4260_s15 + $0x134] ss:$76 sps:$4 sm:$0xff]   ;;  %v3413_v45 = vld [vmem:[%s4260_s15 + $0x13c] ss:$76 sps:$4 sm:$0xff]   ;;  %v3416_v47 = vld [vmem:[%s4260_s15 + $0x138] ss:$76 sps:$4 sm:$0xff]  }
 0x2dd   : > { %2108 = vmatpush1.bf16.msra.mxu1 %v3404_v39  ;;  %2068 = vmatprep.subr.bf16.mxu0 %v3405_v40  ;;  %v3415_v46 = vld [vmem:[%s4260_s15 + $0x130] ss:$76 sps:$4 sm:$0xff]   ;;  %v3417_v48 = vld [vmem:[%s4260_s15 + $0x1cc] ss:$76 sps:$4 sm:$0xff]   ;;  %v3419_v49 = vld [vmem:[%s4260_s15 + $0x1d4] ss:$76 sps:$4 sm:$0xff]  }
 0x2de   : > { %2109 = vmatprep.subr.bf16.mxu1 %v3407_v41  ;;  %v3421_v50 = vld [vmem:[%s4260_s15 + $0x1c8] ss:$76 sps:$4 sm:$0xff]   ;;  %v3422_v51 = vld [vmem:[%s4260_s15 + $0x1d0] ss:$76 sps:$4 sm:$0xff]   ;;  %v3425_v53 = vld [vmem:[%s4260_s15 + $0x26c] ss:$76 sps:$4 sm:$0xff]  }
 0x2df   : > { %v3423_v52 = vld [vmem:[%s4260_s15 + $0x264] ss:$76 sps:$4 sm:$0xff]   ;;  %v3427_v54 = vld [vmem:[%s4260_s15 + $0x260] ss:$76 sps:$4 sm:$0xff]   ;;  %v3428_v55 = vld [vmem:[%s4260_s15 + $0x268] ss:$76 sps:$4 sm:$0xff]  }
 0x2e0   : > { %2069 = vmatpush1.bf16.msra.mxu0 %v3409_v42  ;;  %v3429_v56 = vld [vmem:[%s4260_s15 + $0x2fc] ss:$76 sps:$4 sm:$0xff]   ;;  %v3431_v57 = vld [vmem:[%s4260_s15 + $0x304] ss:$76 sps:$4 sm:$0xff]   ;;  %v3434_v59 = vld [vmem:[%s4260_s15 + $0x300] ss:$76 sps:$4 sm:$0xff]  }
 0x2e1   : > { %2110 = vmatpush1.bf16.msra.mxu1 %v3410_v43  ;;  %2070 = vmatprep.subr.bf16.mxu0 %v3411_v44  ;;  %v3433_v58 = vld [vmem:[%s4260_s15 + $0x2f8] ss:$76 sps:$4 sm:$0xff]   ;;  %v3435_v60 = vld [vmem:[%s4260_s15 + $0x394] ss:$76 sps:$4 sm:$0xff]   ;;  %v3437_v61 = vld [vmem:[%s4260_s15 + $0x39c] ss:$76 sps:$4 sm:$0xff]  }
 0x2e2   : > { %2111 = vmatprep.subr.bf16.mxu1 %v3413_v45  ;;  %v3439_v62 = vld [vmem:[%s4260_s15 + $0x390] ss:$76 sps:$4 sm:$0xff]   ;;  %v3440_v63 = vld [vmem:[%s4260_s15 + $0x398] ss:$76 sps:$4 sm:$0xff]   ;;  %v3443_v1 = vld [vmem:[%s4260_s15 + $0x434] ss:$76 sps:$4 sm:$0xff]  }
 0x2e3   : > { %v3441_v0 = vld [vmem:[%s4260_s15 + $0x42c] ss:$76 sps:$4 sm:$0xff]   ;;  %v3445_v2 = vld [vmem:[%s4260_s15 + $0x428] ss:$76 sps:$4 sm:$0xff]   ;;  %v3446_v3 = vld [vmem:[%s4260_s15 + $0x430] ss:$76 sps:$4 sm:$0xff]  }
 0x2e4   : > { %2071 = vmatpush1.bf16.msra.mxu0 %v3415_v46  ;;  %v3449_v4 = vld [vmem:[%s4260_s15 + $0x14] ss:$76 sps:$4 sm:$0xff]   ;;  %v3452_v5 = vld [vmem:[%s4260_s15 + $0x1c] ss:$76 sps:$4 sm:$0xff]   ;;  %v4307_v6 = vld [vmem:[#allocation2] sm:$0xf] }
 0x2e5   : > { %2112 = vmatpush1.bf16.msra.mxu1 %v3416_v47  ;;  %2072 = vmatprep.subr.bf16.mxu0 %v3417_v48  ;;  %v3447_v7 = vld [vmem:[%s4260_s15 + $0x10] ss:$76 sps:$4 sm:$0xff]   ;;  %v3450_v8 = vld [vmem:[%s4260_s15 + $0x18] ss:$76 sps:$4 sm:$0xff]   ;;  %v3458_v10 = vld [vmem:[%s4260_s15 + $0xb4] ss:$76 sps:$4 sm:$0xff]  }
 0x2e6   : > { %2113 = vmatprep.subr.bf16.mxu1 %v3419_v49  ;;  %v3455_v9 = vld [vmem:[%s4260_s15 + $0xac] ss:$76 sps:$4 sm:$0xff]   ;;  %v3453_v11 = vld [vmem:[%s4260_s15 + $0xa8] ss:$76 sps:$4 sm:$0xff]   ;;  %v3456_v12 = vld [vmem:[%s4260_s15 + $0xb0] ss:$76 sps:$4 sm:$0xff]  }
 0x2e7   : > { %v3461_v13 = vld [vmem:[%s4260_s15 + $0x144] ss:$76 sps:$4 sm:$0xff]   ;;  %v3464_v14 = vld [vmem:[%s4260_s15 + $0x14c] ss:$76 sps:$4 sm:$0xff]   ;;  %v3462_v16 = vld [vmem:[%s4260_s15 + $0x148] ss:$76 sps:$4 sm:$0xff]  }
 0x2e8   : > { %2073 = vmatpush1.bf16.msra.mxu0 %v3421_v50  ;;  %v3459_v15 = vld [vmem:[%s4260_s15 + $0x140] ss:$76 sps:$4 sm:$0xff]   ;;  %v3467_v17 = vld [vmem:[%s4260_s15 + $0x1dc] ss:$76 sps:$4 sm:$0xff]   ;;  %v3470_v18 = vld [vmem:[%s4260_s15 + $0x1e4] ss:$76 sps:$4 sm:$0xff]  }
 0x2e9   : > { %2114 = vmatpush1.bf16.msra.mxu1 %v3422_v51  ;;  %2074 = vmatprep.subr.bf16.mxu0 %v3423_v52  ;;  %v3465_v19 = vld [vmem:[%s4260_s15 + $0x1d8] ss:$76 sps:$4 sm:$0xff]   ;;  %v3468_v20 = vld [vmem:[%s4260_s15 + $0x1e0] ss:$76 sps:$4 sm:$0xff]   ;;  %v3476_v22 = vld [vmem:[%s4260_s15 + $0x27c] ss:$76 sps:$4 sm:$0xff]  }
 0x2ea   : > { %2115 = vmatprep.subr.bf16.mxu1 %v3425_v53  ;;  %v3473_v21 = vld [vmem:[%s4260_s15 + $0x274] ss:$76 sps:$4 sm:$0xff]   ;;  %v3471_v23 = vld [vmem:[%s4260_s15 + $0x270] ss:$76 sps:$4 sm:$0xff]   ;;  %v3474_v24 = vld [vmem:[%s4260_s15 + $0x278] ss:$76 sps:$4 sm:$0xff]  }
 0x2eb   : > { %v3479_v25 = vld [vmem:[%s4260_s15 + $0x30c] ss:$76 sps:$4 sm:$0xff]   ;;  %v3482_v26 = vld [vmem:[%s4260_s15 + $0x314] ss:$76 sps:$4 sm:$0xff]   ;;  %v3480_v28 = vld [vmem:[%s4260_s15 + $0x310] ss:$76 sps:$4 sm:$0xff]  }
 0x2ec   : > { %2075 = vmatpush1.bf16.msra.mxu0 %v3427_v54  ;;  %v3477_v27 = vld [vmem:[%s4260_s15 + $0x308] ss:$76 sps:$4 sm:$0xff]   ;;  %v3485_v29 = vld [vmem:[%s4260_s15 + $0x3a4] ss:$76 sps:$4 sm:$0xff]   ;;  %v3488_v30 = vld [vmem:[%s4260_s15 + $0x3ac] ss:$76 sps:$4 sm:$0xff]  }
 0x2ed   : > { %2116 = vmatpush1.bf16.msra.mxu1 %v3428_v55  ;;  %2076 = vmatprep.subr.bf16.mxu0 %v3429_v56  ;;  %v3483_v31 = vld [vmem:[%s4260_s15 + $0x3a0] ss:$76 sps:$4 sm:$0xff]   ;;  %v3486_v32 = vld [vmem:[%s4260_s15 + $0x3a8] ss:$76 sps:$4 sm:$0xff]   ;;  %v3494_v34 = vld [vmem:[%s4260_s15 + $0x444] ss:$76 sps:$4 sm:$0xff]  }
 0x2ee   : > { %2117 = vmatprep.subr.bf16.mxu1 %v3431_v57  ;;  %v3491_v33 = vld [vmem:[%s4260_s15 + $0x43c] ss:$76 sps:$4 sm:$0xff]   ;;  %v3489_v35 = vld [vmem:[%s4260_s15 + $0x438] ss:$76 sps:$4 sm:$0xff]   ;;  %v3492_v36 = vld [vmem:[%s4260_s15 + $0x440] ss:$76 sps:$4 sm:$0xff]  }
 0x2ef   : > { %v3497_v38 = vld [vmem:[%s4260_s15 + $0x24] ss:$76 sps:$4 sm:$0xff]   ;;  %v3500_v39 = vld [vmem:[%s4260_s15 + $0x2c] ss:$76 sps:$4 sm:$0xff]   ;;  %v3498_v41 = vld [vmem:[%s4260_s15 + $0x28] ss:$76 sps:$4 sm:$0xff]  }
 0x2f0   : > { %2077 = vmatpush1.bf16.msra.mxu0 %v3433_v58  ;;  %v3495_v40 = vld [vmem:[%s4260_s15 + $0x20] ss:$76 sps:$4 sm:$0xff]   ;;  %v3503_v42 = vld [vmem:[%s4260_s15 + $0xbc] ss:$76 sps:$4 sm:$0xff]   ;;  %v3506_v43 = vld [vmem:[%s4260_s15 + $0xc4] ss:$76 sps:$4 sm:$0xff]  }
 0x2f1   : > { %2118 = vmatpush1.bf16.msra.mxu1 %v3434_v59  ;;  %2078 = vmatprep.subr.bf16.mxu0 %v3435_v60  ;;  %v3501_v44 = vld [vmem:[%s4260_s15 + $0xb8] ss:$76 sps:$4 sm:$0xff]   ;;  %v3504_v45 = vld [vmem:[%s4260_s15 + $0xc0] ss:$76 sps:$4 sm:$0xff]   ;;  %v3512_v47 = vld [vmem:[%s4260_s15 + $0x15c] ss:$76 sps:$4 sm:$0xff]  }
 0x2f2   : > { %2119 = vmatprep.subr.bf16.mxu1 %v3437_v61  ;;  %v3509_v46 = vld [vmem:[%s4260_s15 + $0x154] ss:$76 sps:$4 sm:$0xff]   ;;  %v3507_v48 = vld [vmem:[%s4260_s15 + $0x150] ss:$76 sps:$4 sm:$0xff]   ;;  %v3510_v49 = vld [vmem:[%s4260_s15 + $0x158] ss:$76 sps:$4 sm:$0xff]  }
 0x2f3   : > { %v3515_v50 = vld [vmem:[%s4260_s15 + $0x1ec] ss:$76 sps:$4 sm:$0xff]   ;;  %v3518_v51 = vld [vmem:[%s4260_s15 + $0x1f4] ss:$76 sps:$4 sm:$0xff]   ;;  %v3516_v53 = vld [vmem:[%s4260_s15 + $0x1f0] ss:$76 sps:$4 sm:$0xff]  }
 0x2f4   : > { %2079 = vmatpush1.bf16.msra.mxu0 %v3439_v62  ;;  %v3513_v52 = vld [vmem:[%s4260_s15 + $0x1e8] ss:$76 sps:$4 sm:$0xff]   ;;  %v3521_v54 = vld [vmem:[%s4260_s15 + $0x284] ss:$76 sps:$4 sm:$0xff]   ;;  %v3524_v55 = vld [vmem:[%s4260_s15 + $0x28c] ss:$76 sps:$4 sm:$0xff]  }
 0x2f5   : > { %2120 = vmatpush1.bf16.msra.mxu1 %v3440_v63  ;;  %2080 = vmatprep.subr.bf16.mxu0 %v3441_v0  ;;  %v3519_v56 = vld [vmem:[%s4260_s15 + $0x280] ss:$76 sps:$4 sm:$0xff]   ;;  %v3522_v57 = vld [vmem:[%s4260_s15 + $0x288] ss:$76 sps:$4 sm:$0xff]   ;;  %v3530_v59 = vld [vmem:[%s4260_s15 + $0x324] ss:$76 sps:$4 sm:$0xff]  }
 0x2f6   : > { %2121 = vmatprep.subr.bf16.mxu1 %v3443_v1  ;;  %v3527_v58 = vld [vmem:[%s4260_s15 + $0x31c] ss:$76 sps:$4 sm:$0xff]   ;;  %v3525_v60 = vld [vmem:[%s4260_s15 + $0x318] ss:$76 sps:$4 sm:$0xff]   ;;  %v3528_v61 = vld [vmem:[%s4260_s15 + $0x320] ss:$76 sps:$4 sm:$0xff]  }
 0x2f7   : > { %v3533_v62 = vld [vmem:[%s4260_s15 + $0x3b4] ss:$76 sps:$4 sm:$0xff]   ;;  %v3536_v63 = vld [vmem:[%s4260_s15 + $0x3bc] ss:$76 sps:$4 sm:$0xff]   ;;  %v3534_v1 = vld [vmem:[%s4260_s15 + $0x3b8] ss:$76 sps:$4 sm:$0xff]  }
 0x2f8   : > { %2081 = vmatpush1.bf16.msra.mxu0 %v3445_v2  ;;  %v3531_v0 = vld [vmem:[%s4260_s15 + $0x3b0] ss:$76 sps:$4 sm:$0xff]   ;;  %v3539_v2 = vld [vmem:[%s4260_s15 + $0x44c] ss:$76 sps:$4 sm:$0xff]   ;;  %vm2585_vm3 = vcmask 7168   ;;  %s2588_s29 = smul.u32 2432, %s4023_s28 }
 0x2f9   : > { %2122 = vmatpush1.bf16.msra.mxu1 %v3446_v3  ;;  %2148 = vmatprep.subr.bf16.mxu0 %v3449_v4  ;;  %v3542_v3 = vld [vmem:[%s4260_s15 + $0x454] ss:$76 sps:$4 sm:$0xff]   ;;  %p3090_p10 = scmp.ge.s32.totalorder %s4023_s28, 1 }
 0x2fa   : > { %2189 = vmatprep.subr.bf16.mxu1 %v3452_v5  ;;  %v3537_v4 = vld [vmem:[%s4260_s15 + $0x448] ss:$76 sps:$4 sm:$0xff]   ;;  %v3540_v5 = vld [vmem:[%s4260_s15 + $0x450] ss:$76 sps:$4 sm:$0xff]   ;;  %s2593_s5 = sshra.s32 (!%p3090_p10), %s2588_s29, 7 }
 0x2fb   : > { %2099 = vmatmul.mubr.bf16.vlgmr.msra.gmra.mrb[0].mxu0 %v4307_v6  ;;  %s3091_s11 = sshll.u32 (!%p3090_p10), %s2593_s5, 3 }
 0x2fc   : > { %2140 = vmatmul.mubr.bf16.vlgmr.msra.gmra.mrb[0].mxu1 %v4307_v6  ;;  %2149 = vmatpush1.bf16.msra.mxu0 %v3447_v7  ;;  %v3545_v7 = vld [vmem:[%s4260_s15 + $0x34] ss:$76 sps:$4 sm:$0xff]   ;;  %s2596_s18 = scalar_lea.vmem (!%p3090_p10), [#allocation17], %s3091_s11 }
 0x2fd   : > { %2190 = vmatpush1.bf16.msra.mxu1 %v3450_v8  ;;  %2150 = vmatprep.subr.bf16.mxu0 %v3455_v9  ;;  %v3548_v8 = vld [vmem:[%s4260_s15 + $0x3c] ss:$76 sps:$4 sm:$0xff]  }
 0x2fe   : > { %2191 = vmatprep.subr.bf16.mxu1 %v3458_v10  ;;  %2180 = vmatprep.mubr.bf16.mxu0 %v3959_v37  ;;  %v3543_v9 = vld [vmem:[%s4260_s15 + $0x30] ss:$76 sps:$4 sm:$0xff]   ;;  %v3546_v10 = vld [vmem:[%s4260_s15 + $0x38] ss:$76 sps:$4 sm:$0xff]  }
 0x2ff   : > { %2221 = vmatprep.mubr.bf16.mxu1 %v3959_v37 }
 0x300   : > { %2151 = vmatpush1.bf16.msra.mxu0 %v3453_v11  ;;  %v3551_v11 = vld [vmem:[%s4260_s15 + $0xcc] ss:$76 sps:$4 sm:$0xff]  }
 0x301   : > { %2192 = vmatpush1.bf16.msra.mxu1 %v3456_v12  ;;  %2152 = vmatprep.subr.bf16.mxu0 %v3461_v13  ;;  %v3554_v12 = vld [vmem:[%s4260_s15 + $0xd4] ss:$76 sps:$4 sm:$0xff]  }
 0x302   : > { %2193 = vmatprep.subr.bf16.mxu1 %v3464_v14  ;;  %v3549_v13 = vld [vmem:[%s4260_s15 + $0xc8] ss:$76 sps:$4 sm:$0xff]   ;;  %v3552_v14 = vld [vmem:[%s4260_s15 + $0xd0] ss:$76 sps:$4 sm:$0xff]  }
 0x304   : > { %2153 = vmatpush1.bf16.msra.mxu0 %v3459_v15  ;;  %v3557_v15 = vld [vmem:[%s4260_s15 + $0x164] ss:$76 sps:$4 sm:$0xff]  }
 0x305   : > { %2194 = vmatpush1.bf16.msra.mxu1 %v3462_v16  ;;  %2154 = vmatprep.subr.bf16.mxu0 %v3467_v17  ;;  %v3560_v16 = vld [vmem:[%s4260_s15 + $0x16c] ss:$76 sps:$4 sm:$0xff]  }
 0x306   : > { %2195 = vmatprep.subr.bf16.mxu1 %v3470_v18  ;;  %v3555_v17 = vld [vmem:[%s4260_s15 + $0x160] ss:$76 sps:$4 sm:$0xff]   ;;  %v3558_v18 = vld [vmem:[%s4260_s15 + $0x168] ss:$76 sps:$4 sm:$0xff]  }
 0x308   : > { %2155 = vmatpush1.bf16.msra.mxu0 %v3465_v19  ;;  %v3563_v19 = vld [vmem:[%s4260_s15 + $0x1fc] ss:$76 sps:$4 sm:$0xff]  }
 0x309   : > { %2196 = vmatpush1.bf16.msra.mxu1 %v3468_v20  ;;  %2156 = vmatprep.subr.bf16.mxu0 %v3473_v21  ;;  %v3566_v20 = vld [vmem:[%s4260_s15 + $0x204] ss:$76 sps:$4 sm:$0xff]  }
 0x30a   : > { %2197 = vmatprep.subr.bf16.mxu1 %v3476_v22  ;;  %v3561_v21 = vld [vmem:[%s4260_s15 + $0x1f8] ss:$76 sps:$4 sm:$0xff]   ;;  %v3564_v22 = vld [vmem:[%s4260_s15 + $0x200] ss:$76 sps:$4 sm:$0xff]  }
 0x30c   : > { %2157 = vmatpush1.bf16.msra.mxu0 %v3471_v23  ;;  %v3569_v23 = vld [vmem:[%s4260_s15 + $0x294] ss:$76 sps:$4 sm:$0xff]  }
 0x30d   : > { %2198 = vmatpush1.bf16.msra.mxu1 %v3474_v24  ;;  %2158 = vmatprep.subr.bf16.mxu0 %v3479_v25  ;;  %v3572_v24 = vld [vmem:[%s4260_s15 + $0x29c] ss:$76 sps:$4 sm:$0xff]  }
 0x30e   : > { %2199 = vmatprep.subr.bf16.mxu1 %v3482_v26  ;;  %v3567_v25 = vld [vmem:[%s4260_s15 + $0x290] ss:$76 sps:$4 sm:$0xff]   ;;  %v3570_v26 = vld [vmem:[%s4260_s15 + $0x298] ss:$76 sps:$4 sm:$0xff]  }
 0x310   : > { %2159 = vmatpush1.bf16.msra.mxu0 %v3477_v27  ;;  %v3575_v27 = vld [vmem:[%s4260_s15 + $0x32c] ss:$76 sps:$4 sm:$0xff]  }
 0x311   : > { %2200 = vmatpush1.bf16.msra.mxu1 %v3480_v28  ;;  %2160 = vmatprep.subr.bf16.mxu0 %v3485_v29  ;;  %v3578_v28 = vld [vmem:[%s4260_s15 + $0x334] ss:$76 sps:$4 sm:$0xff]  }
 0x312   : > { %2201 = vmatprep.subr.bf16.mxu1 %v3488_v30  ;;  %v3573_v29 = vld [vmem:[%s4260_s15 + $0x328] ss:$76 sps:$4 sm:$0xff]   ;;  %v3576_v30 = vld [vmem:[%s4260_s15 + $0x330] ss:$76 sps:$4 sm:$0xff]  }
 0x314   : > { %2161 = vmatpush1.bf16.msra.mxu0 %v3483_v31  ;;  %v3581_v31 = vld [vmem:[%s4260_s15 + $0x3c4] ss:$76 sps:$4 sm:$0xff]  }
 0x315   : > { %2202 = vmatpush1.bf16.msra.mxu1 %v3486_v32  ;;  %2162 = vmatprep.subr.bf16.mxu0 %v3491_v33  ;;  %v3584_v32 = vld [vmem:[%s4260_s15 + $0x3cc] ss:$76 sps:$4 sm:$0xff]  }
 0x316   : > { %2203 = vmatprep.subr.bf16.mxu1 %v3494_v34  ;;  %v3579_v33 = vld [vmem:[%s4260_s15 + $0x3c0] ss:$76 sps:$4 sm:$0xff]   ;;  %v3582_v34 = vld [vmem:[%s4260_s15 + $0x3c8] ss:$76 sps:$4 sm:$0xff]  }
 0x318   : > { %2163 = vmatpush1.bf16.msra.mxu0 %v3489_v35  ;;  %v3587_v35 = vld [vmem:[%s4260_s15 + $0x45c] ss:$76 sps:$4 sm:$0xff]  }
 0x319   : > { %2204 = vmatpush1.bf16.msra.mxu1 %v3492_v36  ;;  %2230 = vmatprep.subr.bf16.mxu0 %v3497_v38  ;;  %v3590_v36 = vld [vmem:[%s4260_s15 + $0x464] ss:$76 sps:$4 sm:$0xff]  }
 0x31a   : > { %2271 = vmatprep.subr.bf16.mxu1 %v3500_v39  ;;  %v3585_v38 = vld [vmem:[%s4260_s15 + $0x458] ss:$76 sps:$4 sm:$0xff]   ;;  %v3588_v39 = vld [vmem:[%s4260_s15 + $0x460] ss:$76 sps:$4 sm:$0xff]  }
 0x31b   : > { %2181 = vmatmul.mubr.bf16.vlgmr.msra.gmra.mrb[4].mxu0 %v4307_v6 }
 0x31c   : > { %2222 = vmatmul.mubr.bf16.vlgmr.msra.gmra.mrb[4].mxu1 %v4307_v6  ;;  %2231 = vmatpush1.bf16.msra.mxu0 %v3495_v40  ;;  %v3593_v40 = vld [vmem:[%s4260_s15 + $0x44] ss:$76 sps:$4 sm:$0xff]  }
 0x31d   : > { %2272 = vmatpush1.bf16.msra.mxu1 %v3498_v41  ;;  %2232 = vmatprep.subr.bf16.mxu0 %v3503_v42  ;;  %v3591_v41 = vld [vmem:[%s4260_s15 + $0x40] ss:$76 sps:$4 sm:$0xff]   ;;  %v3594_v42 = vld [vmem:[%s4260_s15 + $0x48] ss:$76 sps:$4 sm:$0xff]  }
 0x31e   : > { %2273 = vmatprep.subr.bf16.mxu1 %v3506_v43  ;;  %2262 = vmatprep.mubr.bf16.mxu0 %v3959_v37  ;;  %v3960_v43 = vmov 0.0  }
 0x31f   : > { %2303 = vmatprep.mubr.bf16.mxu1 %v3959_v37 }
 0x320   : > { %2233 = vmatpush1.bf16.msra.mxu0 %v3501_v44  ;;  %v3597_v44 = vld [vmem:[%s4260_s15 + $0xdc] ss:$76 sps:$4 sm:$0xff]  }
 0x321   : > { %2274 = vmatpush1.bf16.msra.mxu1 %v3504_v45  ;;  %2234 = vmatprep.subr.bf16.mxu0 %v3509_v46  ;;  %v3595_v45 = vld [vmem:[%s4260_s15 + $0xd8] ss:$76 sps:$4 sm:$0xff]   ;;  %v3598_v46 = vld [vmem:[%s4260_s15 + $0xe0] ss:$76 sps:$4 sm:$0xff]  }
 0x322   : > { %2275 = vmatprep.subr.bf16.mxu1 %v3512_v47  ;;  %v3601_v47 = vld [vmem:[%s4260_s15 + $0x174] ss:$76 sps:$4 sm:$0xff]  }
 0x324   : > { %2235 = vmatpush1.bf16.msra.mxu0 %v3507_v48  ;;  %v3599_v48 = vld [vmem:[%s4260_s15 + $0x170] ss:$76 sps:$4 sm:$0xff]  }
 0x325   : > { %2276 = vmatpush1.bf16.msra.mxu1 %v3510_v49  ;;  %2236 = vmatprep.subr.bf16.mxu0 %v3515_v50  ;;  %v3602_v49 = vld [vmem:[%s4260_s15 + $0x178] ss:$76 sps:$4 sm:$0xff]  }
 0x326   : > { %2277 = vmatprep.subr.bf16.mxu1 %v3518_v51  ;;  %v3605_v50 = vld [vmem:[%s4260_s15 + $0x20c] ss:$76 sps:$4 sm:$0xff]   ;;  %v3603_v51 = vld [vmem:[%s4260_s15 + $0x208] ss:$76 sps:$4 sm:$0xff]  }
 0x328   : > { %2237 = vmatpush1.bf16.msra.mxu0 %v3513_v52  ;;  %v3606_v52 = vld [vmem:[%s4260_s15 + $0x210] ss:$76 sps:$4 sm:$0xff]  }
 0x329   : > { %2278 = vmatpush1.bf16.msra.mxu1 %v3516_v53  ;;  %2238 = vmatprep.subr.bf16.mxu0 %v3521_v54  ;;  %v3607_v53 = vld [vmem:[%s4260_s15 + $0x2a0] ss:$76 sps:$4 sm:$0xff]   ;;  %v3610_v54 = vld [vmem:[%s4260_s15 + $0x2a8] ss:$76 sps:$4 sm:$0xff]  }
 0x32a   : > { %2279 = vmatprep.subr.bf16.mxu1 %v3524_v55  ;;  %v3613_v55 = vld [vmem:[%s4260_s15 + $0x33c] ss:$76 sps:$4 sm:$0xff]  }
 0x32c   : > { %2239 = vmatpush1.bf16.msra.mxu0 %v3519_v56  ;;  %v3611_v56 = vld [vmem:[%s4260_s15 + $0x338] ss:$76 sps:$4 sm:$0xff]  }
 0x32d   : > { %2280 = vmatpush1.bf16.msra.mxu1 %v3522_v57  ;;  %2240 = vmatprep.subr.bf16.mxu0 %v3527_v58  ;;  %v3614_v57 = vld [vmem:[%s4260_s15 + $0x340] ss:$76 sps:$4 sm:$0xff]  }
 0x32e   : > { %2281 = vmatprep.subr.bf16.mxu1 %v3530_v59  ;;  %v3617_v58 = vld [vmem:[%s4260_s15 + $0x3d4] ss:$76 sps:$4 sm:$0xff]   ;;  %v3615_v59 = vld [vmem:[%s4260_s15 + $0x3d0] ss:$76 sps:$4 sm:$0xff]  }
 0x330   : > { %2241 = vmatpush1.bf16.msra.mxu0 %v3525_v60  ;;  %v3618_v60 = vld [vmem:[%s4260_s15 + $0x3d8] ss:$76 sps:$4 sm:$0xff]  }
 0x331   : > { %2282 = vmatpush1.bf16.msra.mxu1 %v3528_v61  ;;  %2242 = vmatprep.subr.bf16.mxu0 %v3533_v62  ;;  %v3621_v61 = vld [vmem:[%s4260_s15 + $0x46c] ss:$76 sps:$4 sm:$0xff]   ;;  %v3619_v62 = vld [vmem:[%s4260_s15 + $0x468] ss:$76 sps:$4 sm:$0xff]  }
 0x332   : > { %2283 = vmatprep.subr.bf16.mxu1 %v3536_v63  ;;  %v3622_v63 = vld [vmem:[%s4260_s15 + $0x470] ss:$76 sps:$4 sm:$0xff]  }
 0x334   : > { %2243 = vmatpush1.bf16.msra.mxu0 %v3531_v0 }
 0x335   : > { %2284 = vmatpush1.bf16.msra.mxu1 %v3534_v1  ;;  %2244 = vmatprep.subr.bf16.mxu0 %v3539_v2 }
 0x336   : > { %2285 = vmatprep.subr.bf16.mxu1 %v3542_v3 }
 0x338   : > { %2245 = vmatpush1.bf16.msra.mxu0 %v3537_v4 }
 0x339   : > { %2286 = vmatpush1.bf16.msra.mxu1 %v3540_v5  ;;  %2312 = vmatprep.subr.bf16.mxu0 %v3545_v7 }
 0x33a   : > { %2353 = vmatprep.subr.bf16.mxu1 %v3548_v8 }
 0x33b   : > { %2263 = vmatmul.mubr.bf16.vlgmr.msra.gmra.mrb[8].mxu0 %v4307_v6 }
 0x33c   : > { %2304 = vmatmul.mubr.bf16.vlgmr.msra.gmra.mrb[8].mxu1 %v4307_v6  ;;  %2313 = vmatpush1.bf16.msra.mxu0 %v3543_v9 }
 0x33d   : > { %2354 = vmatpush1.bf16.msra.mxu1 %v3546_v10  ;;  %2314 = vmatprep.subr.bf16.mxu0 %v3551_v11 }
 0x33e   : > { %2355 = vmatprep.subr.bf16.mxu1 %v3554_v12  ;;  %2344 = vmatprep.mubr.bf16.mxu0 %v3959_v37 }
 0x33f   : > { %2385 = vmatprep.mubr.bf16.mxu1 %v3959_v37 }
 0x340   : > { %2315 = vmatpush1.bf16.msra.mxu0 %v3549_v13 }
 0x341   : > { %2356 = vmatpush1.bf16.msra.mxu1 %v3552_v14  ;;  %2316 = vmatprep.subr.bf16.mxu0 %v3557_v15 }
 0x342   : > { %2357 = vmatprep.subr.bf16.mxu1 %v3560_v16 }
 0x344   : > { %2317 = vmatpush1.bf16.msra.mxu0 %v3555_v17 }
 0x345   : > { %2358 = vmatpush1.bf16.msra.mxu1 %v3558_v18  ;;  %2318 = vmatprep.subr.bf16.mxu0 %v3563_v19 }
 0x346   : > { %2359 = vmatprep.subr.bf16.mxu1 %v3566_v20 }
 0x348   : > { %2319 = vmatpush1.bf16.msra.mxu0 %v3561_v21 }
 0x349   : > { %2360 = vmatpush1.bf16.msra.mxu1 %v3564_v22  ;;  %2320 = vmatprep.subr.bf16.mxu0 %v3569_v23 }
 0x34a   : > { %2361 = vmatprep.subr.bf16.mxu1 %v3572_v24 }
 0x34c   : > { %2321 = vmatpush1.bf16.msra.mxu0 %v3567_v25 }
 0x34d   : > { %2362 = vmatpush1.bf16.msra.mxu1 %v3570_v26  ;;  %2322 = vmatprep.subr.bf16.mxu0 %v3575_v27 }
 0x34e   : > { %2363 = vmatprep.subr.bf16.mxu1 %v3578_v28 }
 0x350   : > { %2323 = vmatpush1.bf16.msra.mxu0 %v3573_v29 }
 0x351   : > { %2364 = vmatpush1.bf16.msra.mxu1 %v3576_v30  ;;  %2324 = vmatprep.subr.bf16.mxu0 %v3581_v31 }
 0x352   : > { %2365 = vmatprep.subr.bf16.mxu1 %v3584_v32  ;;  %v1203_v32 = vlaneseq }
 0x354   : > { %2325 = vmatpush1.bf16.msra.mxu0 %v3579_v33  ;;  %v1204_v33 = vshrl.u32 %v1203_v32, 7 }
 0x355   : > { %2366 = vmatpush1.bf16.msra.mxu1 %v3582_v34  ;;  %2326 = vmatprep.subr.bf16.mxu0 %v3587_v35 }
 0x356   : > { %2367 = vmatprep.subr.bf16.mxu1 %v3590_v36  ;;  %v1221_v34 = vsub.s32 4, %v1204_v33  ;;  %v1229_v35 = vsub.s32 6, %v1204_v33  ;;  %v1205_v36 = vsub.s32 0, %v1204_v33 }
 0x358   : > { %2327 = vmatpush1.bf16.msra.mxu0 %v3585_v38  ;;  %v1209_v38 = vsub.s32 1, %v1204_v33 }
 0x359   : > { %2368 = vmatpush1.bf16.msra.mxu1 %v3588_v39  ;;  %2394 = vmatprep.subr.bf16.mxu0 %v3593_v40  ;;  %v1225_v39 = vsub.s32 5, %v1204_v33  ;;  %v1233_v40 = vsub.s32 7, %v1204_v33 }
 0x35a   : > { %3204 = vmatprep.subr.bf16.mxu1 %v3960_v43 }
 0x35b   : > { %2345 = vmatmul.mubr.bf16.vlgmr.msra.gmra.mrb[12].mxu0 %v4307_v6 }
 0x35c   : > { %2386 = vmatmul.mubr.bf16.vlgmr.msra.gmra.mrb[12].mxu1 %v4307_v6  ;;  %2395 = vmatpush1.bf16.msra.mxu0 %v3591_v41  ;;  %v1197_v41 = vld [vmem:[%s4266_s20] sm:$0xff] }
 0x35d   : > { %3205 = vmatpush3.bf16.msra.mxu1 %v3594_v42  ;;  %2396 = vmatprep.subr.bf16.mxu0 %v3597_v44  ;;  %v1213_v42 = vsub.s32 2, %v1204_v33  ;;  %v1198_v44 = vld [vmem:[%s4266_s20 + $0x8] sm:$0xff] }
 0x35e   : > { %3206 = vmatprep.subr.bf16.mxu1 %v3960_v43  ;;  %2426 = vmatprep.mubr.bf16.mxu0 %v3959_v37  ;;  %v3609_v37 = vld [vmem:[%s4260_s15 + $0x2a4] ss:$76 sps:$4 sm:$0xff]  }
 0x35f   : > { %3220 = vmatprep.mubr.msk.bf16.mxu1 %vm3961_vm2, %v3960_v43 }
 0x360   : > { %2397 = vmatpush1.bf16.msra.mxu0 %v3595_v45  ;;  %v1222_v45 = vrot.slane %v1197_v41, %v1221_v34 }
 0x361   : > { %3207 = vmatpush3.bf16.msra.mxu1 %v3598_v46  ;;  %2398 = vmatprep.subr.bf16.mxu0 %v3601_v47  ;;  %v1230_v46 = vrot.slane %v1197_v41, %v1229_v35  ;;  %v1206_v47 = vrot.slane %v1197_v41, %v1205_v36 }
 0x362   : > { %3208 = vmatprep.subr.bf16.mxu1 %v3960_v43 }
 0x364   : > { %2399 = vmatpush1.bf16.msra.mxu0 %v3599_v48  ;;  %v1210_v48 = vrot.slane %v1197_v41, %v1209_v38 }
 0x365   : > { %3209 = vmatpush3.bf16.msra.mxu1 %v3602_v49  ;;  %2400 = vmatprep.subr.bf16.mxu0 %v3605_v50  ;;  %v1226_v49 = vrot.slane %v1197_v41, %v1225_v39  ;;  %v1234_v50 = vrot.slane %v1197_v41, %v1233_v40 }
 0x366   : > { %3210 = vmatprep.subr.bf16.mxu1 %v3960_v43 }
 0x368   : > { %2401 = vmatpush1.bf16.msra.mxu0 %v3603_v51  ;;  %v1214_v51 = vrot.slane %v1197_v41, %v1213_v42 }
 0x369   : > { %3211 = vmatpush3.bf16.msra.mxu1 %v3606_v52  ;;  %2402 = vmatprep.subr.bf16.mxu0 %v3609_v37  ;;  %v1238_v37 = vrot.slane %v1198_v44, %v1205_v36 }
 0x36a   : > { %3212 = vmatprep.subr.bf16.mxu1 %v3960_v43 }
 0x36c   : > { %2403 = vmatpush1.bf16.msra.mxu0 %v3607_v53  ;;  %v1246_v53 = vrot.slane %v1198_v44, %v1213_v42 }
 0x36d   : > { %3213 = vmatpush3.bf16.msra.mxu1 %v3610_v54  ;;  %2404 = vmatprep.subr.bf16.mxu0 %v3613_v55  ;;  %v1199_v54 = vld [vmem:[%s4266_s20 + $0x10] sm:$0x7]  ;;  %v1242_v55 = vrot.slane %v1198_v44, %v1209_v38 }
 0x36e   : > { %3214 = vmatprep.subr.bf16.mxu1 %v3960_v43 }
 0x370   : > { %2405 = vmatpush1.bf16.msra.mxu0 %v3611_v56 }
 0x371   : > { %3215 = vmatpush3.bf16.msra.mxu1 %v3614_v57  ;;  %2406 = vmatprep.subr.bf16.mxu0 %v3617_v58  ;;  %v1254_v57 = vrot.slane %v1198_v44, %v1221_v34  ;;  %v1262_v58 = vrot.slane %v1198_v44, %v1229_v35 }
 0x372   : > { %3216 = vmatprep.subr.bf16.mxu1 %v3960_v43 }
 0x374   : > { %2407 = vmatpush1.bf16.msra.mxu0 %v3615_v59 }
 0x375   : > { %3217 = vmatpush3.bf16.msra.mxu1 %v3618_v60  ;;  %2408 = vmatprep.subr.bf16.mxu0 %v3621_v61  ;;  %v1258_v61 = vrot.slane %v1198_v44, %v1225_v39 }
 0x376   : > { %3218 = vmatprep.subr.bf16.mxu1 %v3960_v43  ;;  %v1217_v43 = vsub.s32 3, %v1204_v33 }
 0x378   : > { %2409 = vmatpush1.bf16.msra.mxu0 %v3619_v62  ;;  %v1218_v52 = vrot.slane %v1197_v41, %v1217_v43  ;;  %v1250_v56 = vrot.slane %v1198_v44, %v1217_v43  ;;  %v1266_v62 = vrot.slane %v1198_v44, %v1233_v40 }
 0x379   : > { %3219 = vmatpush3.bf16.msra.mxu1 %v3622_v63 }
 0x37b   : > { %2427 = vmatmul.mubr.bf16.vlgmr.msra.gmra.mrb[16].mxu0 %v4307_v6 }
 0x37c   : > { %3221 = vmatmul.mubr.bf16.vlgmr.msra.gmra.mrb[16].mxu1 %v4307_v6 }
 0x3ce   : > { %v4444_v0 = vpop.f32.mrb[0].mxu0 }
 0x3cf   : > { %v4446_v1 = vpop.f32.mrb[0].mxu1  ;;  %v4448_v2 = vpop.f32.mrb[1].mxu0 }
 0x3d0   : > { %v4450_v3 = vpop.f32.mrb[1].mxu1  ;;  %v2104_v4 = vpop.f32.mrb[2].mxu0 }
 0x3d1   : > { %v2145_v5 = vpop.f32.mrb[2].mxu1  ;;  %v2105_v7 = vpop.f32.mrb[3].mxu0 }
 0x3d2   : > { %v2146_v8 = vpop.f32.mrb[3].mxu1  ;;  %v1270_v5 = vrot.slane %v1199_v54, %v1205_v36  ;;  %v1278_v7 = vrot.slane %v1199_v54, %v1213_v42 }
 0x3d3   : > { %v2101_v8 = vadd.f32 %v4444_v0, %v1206_v47 }
 0x3ee   : > { %v2182_v9 = vpop.f32.mrb[4].mxu0 }
 0x3ef   : > { %v2223_v10 = vpop.f32.mrb[4].mxu1  ;;  %v2184_v11 = vpop.f32.mrb[5].mxu0  ;;  %v4455_v59 = vadd.f32 %v2182_v9, %v1222_v45  ;;  %v2103_v9 = vadd.f32 %v4448_v2, %v1210_v48  ;;  %v1274_v2 = vrot.slane %v1199_v54, %v1209_v38 }
 0x3f0   : > { %v2225_v12 = vpop.f32.mrb[5].mxu1  ;;  %v2186_v13 = vpop.f32.mrb[6].mxu0  ;;  %v4457_v60 = vadd.f32 %v2223_v10, %v1230_v46  ;;  %v4459_v63 = vadd.f32 %v2184_v11, %v1226_v49  ;;  %v2144_v10 = vadd.f32 %v4450_v3, %v1218_v52  ;;  %v4504_v46 = vld [vmem:[#allocation3] sm:$0xff] }
 0x3f1   : > { %v2227_v14 = vpop.f32.mrb[6].mxu1  ;;  %v2187_v15 = vpop.f32.mrb[7].mxu0  ;;  %v4461_v4 = vadd.f32 %v2225_v12, %v1234_v50  ;;  %v2142_v13 = vadd.f32 %v4446_v1, %v1214_v51  ;;  %v2476_v12 = vmax.f32 %v2101_v8, %v4455_v59 }
 0x3f2   : > { %v2228_v6 = vpop.f32.mrb[7].mxu1  ;;  %v2477_v1 = vmax.f32 %v2103_v9, %v4459_v63 }
 0x40e   : > { %v2264_v16 = vpop.f32.mrb[8].mxu0 }
 0x40f   : > { %v2305_v17 = vpop.f32.mrb[8].mxu1  ;;  %v2266_v18 = vpop.f32.mrb[9].mxu0  ;;  %v4465_v14 = vadd.f32 %v2264_v16, %v1238_v37  ;;  %v2479_v16 = vmax.f32 %v2144_v10, %v4461_v4 }
 0x410   : > { %v2307_v19 = vpop.f32.mrb[9].mxu1  ;;  %v2268_v20 = vpop.f32.mrb[10].mxu0  ;;  %v4467_v15 = vadd.f32 %v2305_v17, %v1246_v53  ;;  %v4471_v6 = vadd.f32 %v2266_v18, %v1242_v55 }
 0x411   : > { %v2309_v21 = vpop.f32.mrb[10].mxu1  ;;  %v2269_v22 = vpop.f32.mrb[11].mxu0  ;;  %v4473_v11 = vadd.f32 %v2307_v19, %v1250_v56  ;;  %v2478_v20 = vmax.f32 %v2142_v13, %v4457_v60  ;;  %v2480_v3 = vmax.f32 %v2476_v12, %v4465_v14 }
 0x412   : > { %v2310_v23 = vpop.f32.mrb[11].mxu1  ;;  %v2481_v22 = vmax.f32 %v2477_v1, %v4471_v6 }
 0x413   : > { %v2482_v18 = vmax.f32 %v2478_v20, %v4467_v15  ;;  %v2483_v23 = vmax.f32 %v2479_v16, %v4473_v11 }
 0x42e   : > { %v2346_v24 = vpop.f32.mrb[12].mxu0 }
 0x42f   : > { %v2387_v25 = vpop.f32.mrb[12].mxu1  ;;  %v2348_v26 = vpop.f32.mrb[13].mxu0  ;;  %v4477_v21 = vadd.f32 %v2346_v24, %v1254_v57 }
 0x430   : > { %v2389_v27 = vpop.f32.mrb[13].mxu1  ;;  %v2350_v28 = vpop.f32.mrb[14].mxu0  ;;  %v4479_v0 = vadd.f32 %v2387_v25, %v1262_v58  ;;  %v4483_v17 = vadd.f32 %v2348_v26, %v1258_v61 }
 0x431   : > { %v2391_v29 = vpop.f32.mrb[14].mxu1  ;;  %v2351_v30 = vpop.f32.mrb[15].mxu0  ;;  %v4487_v19 = vadd.f32 %v2389_v27, %v1266_v62  ;;  %v2484_v28 = vmax.f32 %v2480_v3, %v4477_v21 }
 0x432   : > { %v2392_v31 = vpop.f32.mrb[15].mxu1  ;;  %v2486_v29 = vmax.f32 %v2482_v18, %v4479_v0  ;;  %v2485_v33 = vmax.f32 %v2481_v22, %v4483_v17 }
 0x433   : > { %v2487_v36 = vmax.f32 %v2483_v23, %v4487_v19 }
 0x44e   : > { %v2428_v24 = vpop.f32.mrb[16].mxu0 }
 0x44f   : > { %v2469_v25 = vpop.f32.mrb[16].mxu1  ;;  %v4493_v30 = vadd.f32 %v2428_v24, %v1270_v5  ;;  %v2430_v31 = vpop.f32.mrb[17].mxu0 }
 0x450   : > { %v4495_v26 = vadd.f32 %v2469_v25, %v1278_v7  ;;  %v3222_v32 = vpop.f32.mrb[17].mxu1  ;;  %v4498_v27 = vadd.f32 %v2430_v31, %v1274_v2  ;;  %v2432_v34 = vpop.f32.mrb[18].mxu0 }
 0x451   : > { %v2472_v35 = vpop.f32.mrb[18].mxu1  ;;  %v2488_v38 = vmax.f32 %v2484_v28, %v4493_v30  ;;  %v2433_v40 = vpop.f32.mrb[19].mxu0 }
 0x452   : > { %v2490_v39 = vmax.f32 %v2486_v29, %v4495_v26  ;;  %v3223_v41 = vpop.f32.mrb[19].mxu1  ;;  %v2489_v42 = vmax.f32 %v2485_v33, %v4498_v27 }
 0x454   : > { %v2492_v43 = vmax.f32 %v2490_v39, %v2487_v36  ;;  %v2491_v44 = vmax.f32 %v2488_v38, %v2489_v42 }
 0x456   : > { %v2493_v45 = vmax.f32 %v2491_v44, %v2492_v43 }
 0x458   : > { %2494 = vmax.xlane.f32.xlu0 %v2493_v45 }
 0x4e5   : > { %v2495_v47 = vpop.xlane.xlu0 %2494 }
 0x4e6   : > { %v4507_v48 = vmax.f32 %v4504_v46, %v2495_v47 }
 0x4e8   : > { %v2497_v49 = vsub.f32 %v4504_v46, %v4507_v48  ;;  %2587 = vst.msk [vmem:[#allocation3] sm:$0xff] %vm2585_vm3, %v4507_v48  ;;  %2502 = vperm.xlu0 %3398, %v4507_v48  }
 0x567   : > { %v4514_v50 = vpop.permute.xlu0 %2502 }
 0x568   : > { %v2505_v51 = vsub.f32 %v2101_v8, %v4514_v50  ;;  %v2506_v52 = vsub.f32 %v2103_v9, %v4514_v50  ;;  %v2507_v37 = vsub.f32 %v2142_v13, %v4514_v50  ;;  %v2508_v53 = vsub.f32 %v2144_v10, %v4514_v50 }
 0x569   : > { %v2509_v55 = vsub.f32 %v4455_v59, %v4514_v50  ;;  %v2510_v58 = vsub.f32 %v4459_v63, %v4514_v50  ;;  %v2511_v62 = vsub.f32 %v4457_v60, %v4514_v50  ;;  %v2512_v7 = vsub.f32 %v4461_v4, %v4514_v50 }
 0x56a   : > { %v2524_v54 = vmul.f32 1.442695, %v2505_v51  ;;  %v2526_v56 = vmul.f32 1.442695, %v2506_v52  ;;  %v2528_v57 = vmul.f32 1.442695, %v2507_v37  ;;  %v2513_v59 = vsub.f32 %v4465_v14, %v4514_v50 }
 0x56b   : > { %v2530_v61 = vmul.f32 1.442695, %v2508_v53  ;;  %v2532_v5 = vmul.f32 1.442695, %v2509_v55  ;;  %v2534_v8 = vmul.f32 1.442695, %v2510_v58  ;;  %v2514_v63 = vsub.f32 %v4471_v6, %v4514_v50 }
 0x56c   : > { %3623 = vpow2.f32 %v2524_v54  ;;  %v2536_v13 = vmul.f32 1.442695, %v2511_v62  ;;  %v2538_v9 = vmul.f32 1.442695, %v2512_v7  ;;  %v2515_v12 = vsub.f32 %v4467_v15, %v4514_v50 }
 0x56d   : > { %3625 = vpow2.f32 %v2526_v56  ;;  %v2540_v4 = vmul.f32 1.442695, %v2513_v59  ;;  %v2516_v1 = vsub.f32 %v4473_v11, %v4514_v50  ;;  %v2542_v6 = vmul.f32 1.442695, %v2514_v63  ;;  %v2562_v63 = vld [vmem:[#allocation4] sm:$0xff] }
 0x56e   : > { %3627 = vpow2.f32 %v2528_v57  ;;  %v2517_v3 = vsub.f32 %v4477_v21, %v4514_v50  ;;  %v2544_v15 = vmul.f32 1.442695, %v2515_v12  ;;  %v2518_v23 = vsub.f32 %v4483_v17, %v4514_v50 }
 0x56f   : > { %3629 = vpow2.f32 %v2530_v61  ;;  %v2546_v11 = vmul.f32 1.442695, %v2516_v1  ;;  %v2519_v28 = vsub.f32 %v4479_v0, %v4514_v50  ;;  %v2520_v32 = vsub.f32 %v4487_v19, %v4514_v50 }
 0x570   : > { %3631 = vpow2.f32 %v2532_v5  ;;  %v2548_v21 = vmul.f32 1.442695, %v2517_v3  ;;  %v2550_v17 = vmul.f32 1.442695, %v2518_v23  ;;  %v2521_v35 = vsub.f32 %v4493_v30, %v4514_v50 }
 0x571   : > { %3633 = vpow2.f32 %v2534_v8  ;;  %v2552_v0 = vmul.f32 1.442695, %v2519_v28  ;;  %v2522_v39 = vsub.f32 %v4498_v27, %v4514_v50  ;;  %v2554_v19 = vmul.f32 1.442695, %v2520_v32 }
 0x572   : > { %3635 = vpow2.f32 %v2536_v13  ;;  %v2523_v42 = vsub.f32 %v4495_v26, %v4514_v50  ;;  %v2556_v30 = vmul.f32 1.442695, %v2521_v35  ;;  %v2498_v59 = vmul.f32 1.442695, %v2497_v49 }
 0x573   : > { %3637 = vpow2.f32 %v2538_v9  ;;  %v2558_v45 = vmul.f32 1.442695, %v2522_v39 }
 0x574   : > { %3639 = vpow2.f32 %v2540_v4  ;;  %v2560_v51 = vmul.f32 1.442695, %v2523_v42 }
 0x575   : > { %3641 = vpow2.f32 %v2542_v6 }
 0x576   : > { %v4532_v10 = vpop.eup %3623  ;;  %3643 = vpow2.f32 %v2544_v15 }
 0x577   : > { %v4534_v60 = vpop.eup %3625  ;;  %3645 = vpow2.f32 %v2546_v11  ;;  %2597 = vst [vmem:[%s2596_s18] sm:$0xff] (!%p3090_p10), %v4532_v10 }
 0x578   : > { %v2564_v20 = vadd.f32 %v4534_v60, %v4532_v10  ;;  %v4540_v14 = vpop.eup %3627  ;;  %3647 = vpow2.f32 %v2548_v21  ;;  %2598 = vst [vmem:[%s2596_s18 + $0x8] sm:$0xff] (!%p3090_p10), %v4534_v60 }
 0x579   : > { %v4545_v2 = vpop.eup %3629  ;;  %3649 = vpow2.f32 %v2550_v17  ;;  %2599 = vst [vmem:[%s2596_s18 + $0x10] sm:$0xff] (!%p3090_p10), %v4540_v14 }
 0x57a   : > { %v2565_v16 = vadd.f32 %v4540_v14, %v2564_v20  ;;  %v4550_v22 = vpop.eup %3631  ;;  %3651 = vpow2.f32 %v2552_v0  ;;  %2600 = vst [vmem:[%s2596_s18 + $0x18] sm:$0xff] (!%p3090_p10), %v4545_v2 }
 0x57b   : > { %v4555_v25 = vpop.eup %3633  ;;  %3653 = vpow2.f32 %v2554_v19  ;;  %2601 = vst [vmem:[%s2596_s18 + $0x20] sm:$0xff] (!%p3090_p10), %v4550_v22 }
 0x57c   : > { %v2566_v18 = vadd.f32 %v4545_v2, %v2565_v16  ;;  %v4560_v31 = vpop.eup %3635  ;;  %3655 = vpow2.f32 %v2556_v30  ;;  %2602 = vst [vmem:[%s2596_s18 + $0x28] sm:$0xff] (!%p3090_p10), %v4555_v25 }
 0x57d   : > { %v4565_v34 = vpop.eup %3637  ;;  %3657 = vpow2.f32 %v2558_v45  ;;  %2603 = vst [vmem:[%s2596_s18 + $0x30] sm:$0xff] (!%p3090_p10), %v4560_v31 }
 0x57e   : > { %v2567_v24 = vadd.f32 %v4550_v22, %v2566_v18  ;;  %v4570_v38 = vpop.eup %3639  ;;  %3659 = vpow2.f32 %v2560_v51  ;;  %2604 = vst [vmem:[%s2596_s18 + $0x38] sm:$0xff] (!%p3090_p10), %v4565_v34 }
 0x57f   : > { %v4575_v41 = vpop.eup %3641  ;;  %3661 = vpow2.f32 %v2498_v59  ;;  %2605 = vst [vmem:[%s2596_s18 + $0x40] sm:$0xff] (!%p3090_p10), %v4570_v38 }
 0x580   : > { %v2568_v29 = vadd.f32 %v4555_v25, %v2567_v24  ;;  %v4580_v44 = vpop.eup %3643  ;;  %2606 = vst [vmem:[%s2596_s18 + $0x48] sm:$0xff] (!%p3090_p10), %v4575_v41 }
 0x581   : > { %v4583_v27 = vpop.eup %3645  ;;  %2607 = vst [vmem:[%s2596_s18 + $0x50] sm:$0xff] (!%p3090_p10), %v4580_v44 }
 0x582   : > { %v2569_v33 = vadd.f32 %v4560_v31, %v2568_v29  ;;  %v4586_v37 = vpop.eup %3647  ;;  %2608 = vst [vmem:[%s2596_s18 + $0x58] sm:$0xff] (!%p3090_p10), %v4583_v27 }
 0x583   : > { %v4589_v50 = vpop.eup %3649  ;;  %2609 = vst [vmem:[%s2596_s18 + $0x60] sm:$0xff] (!%p3090_p10), %v4586_v37 }
 0x584   : > { %v2570_v36 = vadd.f32 %v4565_v34, %v2569_v33  ;;  %v4592_v54 = vpop.eup %3651  ;;  %2610 = vst [vmem:[%s2596_s18 + $0x68] sm:$0xff] (!%p3090_p10), %v4589_v50 }
 0x585   : > { %v4595_v56 = vpop.eup %3653  ;;  %2611 = vst [vmem:[%s2596_s18 + $0x70] sm:$0xff] (!%p3090_p10), %v4592_v54 }
 0x586   : > { %v2571_v40 = vadd.f32 %v4570_v38, %v2570_v36  ;;  %v4598_v58 = vpop.eup %3655  ;;  %2612 = vst [vmem:[%s2596_s18 + $0x78] sm:$0xff] (!%p3090_p10), %v4595_v56 }
 0x587   : > { %v4601_v62 = vpop.eup %3657  ;;  %2613 = vst [vmem:[%s2596_s18 + $0x80] sm:$0xff] (!%p3090_p10), %v4598_v58 }
 0x588   : > { %v2572_v43 = vadd.f32 %v4575_v41, %v2571_v40  ;;  %v4604_v7 = vpop.eup %3659  ;;  %2614 = vst [vmem:[%s2596_s18 + $0x88] sm:$0xff] (!%p3090_p10), %v4601_v62 }
 0x589   : > { %v3662_v13 = vpop.eup %3661  ;;  %2615 = vst [vmem:[%s2596_s18 + $0x90] sm:$0xff] (!%p3090_p10), %v4604_v7 }
 0x58a   : > { %v2573_v47 = vadd.f32 %v4580_v44, %v2572_v43  ;;  %v2563_v9 = vmul.f32 %v3662_v13, %v2562_v63 }
 0x58c   : > { %v2574_v52 = vadd.f32 %v4583_v27, %v2573_v47 }
 0x58e   : > { %v2575_v26 = vadd.f32 %v4586_v37, %v2574_v52 }
 0x590   : > { %v2576_v53 = vadd.f32 %v4589_v50, %v2575_v26 }
 0x592   : > { %v2577_v55 = vadd.f32 %v4592_v54, %v2576_v53 }
 0x594   : > { %v2578_v57 = vadd.f32 %v4595_v56, %v2577_v55 }
 0x596   : > { %v2579_v61 = vadd.f32 %v4598_v58, %v2578_v57 }
 0x598   : > { %v2580_v5 = vadd.f32 %v4601_v62, %v2579_v61 }
 0x59a   : > { %v2581_v8 = vadd.f32 %v4604_v7, %v2580_v5 }
 0x59c   : > { %2582 = vadd.xlane.f32.xlu1 %v2581_v8 }
 0x626   : > { %2592 = sbr.rel (%p3090_p10) target bundleno = 1581 (0x62d), region = 84 }
 0x629   : > { %v2583_v12 = vpop.xlane.xlu1 %2582 }
 0x62a   : > { %v2584_v4 = vadd.f32 %v2583_v12, %v2563_v9 }
 0x62c   : > { %2586 = vst.msk [vmem:[#allocation4] sm:$0xff] %vm2585_vm3, %v2584_v4 }
 0x62d PF: > { %p3092_p1 = scmp.ne.s32.totalorder %s4023_s28, 1 }
 0x62e   : > { %v3962_v48 = vmov (!%p3092_p1), 0   ;;  %s2646_s16 = sshra.s32 (!%p3092_p1), %s2588_s29, 7 }
 0x62f   : > { %2619 = sbr.rel (%p3092_p1) target bundleno = 1758 (0x6de), region = 88  ;;  %3663 = vset.pattern.permute.xlu0 (!%p3092_p1), %v3962_v48  ;;  %s3093_s12 = sshll.u32 (!%p3092_p1), %s2646_s16, 3 }
 0x630   : > { %s2649_s10 = scalar_lea.vmem (!%p3092_p1), [#allocation17], %s3093_s12 }
 0x633   : > { %v2620_v46 = vld [vmem:[#allocation4] sm:$0xff] (!%p3092_p1) }
 0x634   : > { %3664 = vrcp.f32 (!%p3092_p1), %v2620_v46 }
 0x63e   : > { %v3665_v49 = vpop.eup %3664 }
 0x63f   : > { %2624 = vperm.xlu0 %3663, %v3665_v49   ;;  %v2669_v20 = vmul.f32 %v3665_v49, %v3662_v13 }
 0x643   : > { %2691 = vperm.xlu0 %3663, %v2669_v20  }
 0x6be   : > { %v2625_v1 = vpop.permute.xlu0 %2624 }
 0x6bf   : > { %v2627_v6 = vmul.f32 %v4532_v10, %v2625_v1  ;;  %v2628_v16 = vmul.f32 %v4534_v60, %v2625_v1  ;;  %v2629_v3 = vmul.f32 %v4540_v14, %v2625_v1  ;;  %v2630_v15 = vmul.f32 %v4545_v2, %v2625_v1 }
 0x6c0   : > { %v2631_v18 = vmul.f32 %v4550_v22, %v2625_v1  ;;  %v2632_v23 = vmul.f32 %v4555_v25, %v2625_v1  ;;  %v2633_v11 = vmul.f32 %v4560_v31, %v2625_v1  ;;  %v2634_v24 = vmul.f32 %v4565_v34, %v2625_v1 }
 0x6c1   : > { %v2635_v28 = vmul.f32 %v4570_v38, %v2625_v1  ;;  %v2636_v21 = vmul.f32 %v4575_v41, %v2625_v1  ;;  %v2637_v10 = vmul.f32 %v4580_v44, %v2625_v1  ;;  %v2638_v60 = vmul.f32 %v4583_v27, %v2625_v1  ;;  %2650 = vst [vmem:[%s2649_s10] sm:$0xff] %v2627_v6 }
 0x6c2   : > { %2651 = vst [vmem:[%s2649_s10 + $0x8] sm:$0xff] %v2628_v16  ;;  %2652 = vst [vmem:[%s2649_s10 + $0x10] sm:$0xff] %v2629_v3  ;;  %v2639_v14 = vmul.f32 %v4586_v37, %v2625_v1  ;;  %v2640_v2 = vmul.f32 %v4589_v50, %v2625_v1  ;;  %v2641_v22 = vmul.f32 %v4592_v54, %v2625_v1  ;;  %v2692_v35 = vpop.permute.xlu0 %2691 }
 0x6c3   : > { %2653 = vst [vmem:[%s2649_s10 + $0x18] sm:$0xff] %v2630_v15  ;;  %v2642_v25 = vmul.f32 %v4595_v56, %v2625_v1  ;;  %2654 = vst [vmem:[%s2649_s10 + $0x20] sm:$0xff] %v2631_v18  ;;  %v2643_v29 = vmul.f32 %v4598_v58, %v2625_v1  ;;  %v2644_v31 = vmul.f32 %v4601_v62, %v2625_v1 }
 0x6c4   : > { %2655 = vst [vmem:[%s2649_s10 + $0x28] sm:$0xff] %v2632_v23  ;;  %2656 = vst [vmem:[%s2649_s10 + $0x30] sm:$0xff] %v2633_v11  ;;  %v2645_v32 = vmul.f32 %v4604_v7, %v2625_v1 }
 0x6c5   : > { %2657 = vst [vmem:[%s2649_s10 + $0x38] sm:$0xff] %v2634_v24  ;;  %2658 = vst [vmem:[%s2649_s10 + $0x40] sm:$0xff] %v2635_v28 }
 0x6c6   : > { %2659 = vst [vmem:[%s2649_s10 + $0x48] sm:$0xff] %v2636_v21  ;;  %2660 = vst [vmem:[%s2649_s10 + $0x50] sm:$0xff] %v2637_v10 }
 0x6c7   : > { %2661 = vst [vmem:[%s2649_s10 + $0x58] sm:$0xff] %v2638_v60  ;;  %2662 = vst [vmem:[%s2649_s10 + $0x60] sm:$0xff] %v2639_v14 }
 0x6c8   : > { %2663 = vst [vmem:[%s2649_s10 + $0x68] sm:$0xff] %v2640_v2  ;;  %2664 = vst [vmem:[%s2649_s10 + $0x70] sm:$0xff] %v2641_v22 }
 0x6c9   : > { %2665 = vst [vmem:[%s2649_s10 + $0x78] sm:$0xff] %v2642_v25  ;;  %2666 = vst [vmem:[%s2649_s10 + $0x80] sm:$0xff] %v2643_v29 }
 0x6ca   : > { %2667 = vst [vmem:[%s2649_s10 + $0x88] sm:$0xff] %v2644_v31  ;;  %2668 = vst [vmem:[%s2649_s10 + $0x90] sm:$0xff] %v2645_v32 }
 0x6d1   : > { %v2670_v17 = vld [vmem:[#allocation17] sm:$0xff]  ;;  %v2671_v33 = vld [vmem:[#allocation17 + $0x8] sm:$0xff]  ;;  %v2672_v34 = vld [vmem:[#allocation17 + $0x10] sm:$0xff] }
 0x6d2   : > { %v2673_v0 = vld [vmem:[#allocation17 + $0x18] sm:$0xff]  ;;  %v2674_v36 = vld [vmem:[#allocation17 + $0x20] sm:$0xff]  ;;  %v2675_v38 = vld [vmem:[#allocation17 + $0x28] sm:$0xff]  ;;  %v2694_v39 = vmul.f32 %v2692_v35, %v2670_v17  ;;  %v2695_v19 = vmul.f32 %v2692_v35, %v2671_v33  ;;  %v2696_v40 = vmul.f32 %v2692_v35, %v2672_v34 }
 0x6d3   : > { %v2676_v41 = vld [vmem:[#allocation17 + $0x30] sm:$0xff]  ;;  %v2677_v42 = vld [vmem:[#allocation17 + $0x38] sm:$0xff]  ;;  %v2678_v30 = vld [vmem:[#allocation17 + $0x40] sm:$0xff]  ;;  %v2697_v43 = vmul.f32 %v2692_v35, %v2673_v0  ;;  %v2698_v44 = vmul.f32 %v2692_v35, %v2674_v36  ;;  %v2699_v45 = vmul.f32 %v2692_v35, %v2675_v38 }
 0x6d4   : > { %v2679_v47 = vld [vmem:[#allocation17 + $0x48] sm:$0xff]  ;;  %v2680_v27 = vld [vmem:[#allocation17 + $0x50] sm:$0xff]  ;;  %v2681_v51 = vld [vmem:[#allocation17 + $0x58] sm:$0xff]  ;;  %v2700_v52 = vmul.f32 %v2692_v35, %v2676_v41  ;;  %v2701_v37 = vmul.f32 %v2692_v35, %v2677_v42  ;;  %v2702_v26 = vmul.f32 %v2692_v35, %v2678_v30  ;;  %2713 = vst [vmem:[#allocation17] sm:$0xff] %v2694_v39 }
 0x6d5   : > { %2714 = vst [vmem:[#allocation17 + $0x8] sm:$0xff] %v2695_v19  ;;  %2715 = vst [vmem:[#allocation17 + $0x10] sm:$0xff] %v2696_v40  ;;  %v2682_v50 = vld [vmem:[#allocation17 + $0x60] sm:$0xff]  ;;  %v2683_v53 = vld [vmem:[#allocation17 + $0x68] sm:$0xff]  ;;  %v2703_v55 = vmul.f32 %v2692_v35, %v2679_v47  ;;  %v2704_v56 = vmul.f32 %v2692_v35, %v2680_v27  ;;  %v2705_v57 = vmul.f32 %v2692_v35, %v2681_v51 }
 0x6d6   : > { %v2684_v54 = vld [vmem:[#allocation17 + $0x70] sm:$0xff]  ;;  %2716 = vst [vmem:[#allocation17 + $0x18] sm:$0xff] %v2697_v43  ;;  %2717 = vst [vmem:[#allocation17 + $0x20] sm:$0xff] %v2698_v44  ;;  %v2685_v58 = vld [vmem:[#allocation17 + $0x78] sm:$0xff]  ;;  %v2706_v5 = vmul.f32 %v2692_v35, %v2682_v50  ;;  %v2707_v7 = vmul.f32 %v2692_v35, %v2683_v53 }
 0x6d7   : > { %2718 = vst [vmem:[#allocation17 + $0x28] sm:$0xff] %v2699_v45  ;;  %v2686_v61 = vld [vmem:[#allocation17 + $0x80] sm:$0xff]  ;;  %v2687_v62 = vld [vmem:[#allocation17 + $0x88] sm:$0xff]  ;;  %v2708_v8 = vmul.f32 %v2692_v35, %v2684_v54  ;;  %2719 = vst [vmem:[#allocation17 + $0x30] sm:$0xff] %v2700_v52  ;;  %v2709_v13 = vmul.f32 %v2692_v35, %v2685_v58 }
 0x6d8   : > { %2720 = vst [vmem:[#allocation17 + $0x38] sm:$0xff] %v2701_v37  ;;  %2721 = vst [vmem:[#allocation17 + $0x40] sm:$0xff] %v2702_v26  ;;  %v2688_v59 = vld [vmem:[#allocation17 + $0x90] sm:$0xff]  ;;  %v2710_v63 = vmul.f32 %v2692_v35, %v2686_v61  ;;  %v2711_v9 = vmul.f32 %v2692_v35, %v2687_v62 }
 0x6d9   : > { %2722 = vst [vmem:[#allocation17 + $0x48] sm:$0xff] %v2703_v55  ;;  %2723 = vst [vmem:[#allocation17 + $0x50] sm:$0xff] %v2704_v56  ;;  %v2712_v12 = vmul.f32 %v2692_v35, %v2688_v59 }
 0x6da   : > { %2724 = vst [vmem:[#allocation17 + $0x58] sm:$0xff] %v2705_v57  ;;  %2725 = vst [vmem:[#allocation17 + $0x60] sm:$0xff] %v2706_v5 }
 0x6db   : > { %2726 = vst [vmem:[#allocation17 + $0x68] sm:$0xff] %v2707_v7  ;;  %2727 = vst [vmem:[#allocation17 + $0x70] sm:$0xff] %v2708_v8 }
 0x6dc   : > { %2728 = vst [vmem:[#allocation17 + $0x78] sm:$0xff] %v2709_v13  ;;  %2729 = vst [vmem:[#allocation17 + $0x80] sm:$0xff] %v2710_v63 }
 0x6dd   : > { %2730 = vst [vmem:[#allocation17 + $0x88] sm:$0xff] %v2711_v9  ;;  %2731 = vst [vmem:[#allocation17 + $0x90] sm:$0xff] %v2712_v12 }
 0x6de PF: > { %p3290_p4 = scmp.eq.s32.totalorder %s4023_s28, 1  ;;  %s3963_s14 = smov [#allocation17]  }
 0x6df   : > { %s2739_s17 = sshll.u32 %s3963_s14, 4  ;;  %s2740_s17 = int_to_ptr.vmem [resolvable:$true] %s2739_s17 }
 0x6e0   : > { %s3866_s13 = scalar_lea.vmem %s2740_s17, 4864  ;;  %p3873_p6 = scmp.lt.s32.totalorder %s2740_s17, %s2740_s17 }
 0x6e1   : > { %p3867_p5 = scmp.ne.s32.totalorder %s2740_s17, %s3866_s13  ;;  %p3874_p12 = scmp.lt.s32.totalorder %s3866_s13, %s3866_s13 }
 0x6e3   : > { %p3868_p8 = pnand %p3867_p5, %p3290_p4  ;;  %p3875_p0 = por %p3874_p12, %p3873_p6 }
 0x6e5   : > { %p3869_p13 = pneg %p3868_p8 }
 0x6e7   : > { %p3876_p3 = pnand %p3875_p0, %p3869_p13 }
 0x6e9   : > { %3879 = shalt.err (!%p3876_p3)
}
 0x6ea   : > { %s3880_s22 = scalar_lea.hbm %s4699_s7, 4864 }
 0x6eb   : > { %p3881_p7 = scmp.ne.s32.totalorder %s4699_s7, %s3880_s22  ;;  %p3886_p2 = scmp.lt.u32.totalorder %s3880_s22, %s4699_s7 }
 0x6ed   : > { %p3882_p11 = pnand %p3881_p7, %p3290_p4 }
 0x6ef   : > { %p3883_p9 = pneg %p3882_p11 }
 0x6f1   : > { %p3888_p10 = pnand %p3886_p2, %p3883_p9 }
 0x6f3   : > { %3891 = shalt.err (!%p3888_p10)
}
 0x6f4   : > { %3253 = dma.vmem_to_hbm [thread:$0]  (%p3290_p4), %s2740_s17, 4864, %s4699_s7, [#allocation7]  }
 0x6f5   : > { %3925 = dma.done.wait (%p3290_p4), [#allocation7], 4864  }
 0x6f6   : > { %3927 = vsyncadd (%p3290_p4), [#allocation7], 4294962432 }
 0x6f7 PF: > { %s4735_s15 = sld [smem:[#allocation23_spill]]  ;;  %s4736_s23 = smov %s4098_s24 }
 0x6f8   : > { %p21_p1 = scmp.ge.s32.totalorder %s4098_s24, 4   ;;  %s4737_s24 = smov %s3934_s25 }
 0x6f9   : > { %s4738_s25 = smov %s3938_s26  ;;  %s4740_s27 = smov %s4736_s23 }
 0x6fa   :  { %23 = sbr.rel (!%p21_p1) target bundleno = 11 (0xb), region = 131 }
 0x6fd   : > { %s4739_s26 = smov %s4735_s15 }
 0x701   :  { %2752 = vsyncpa [#allocation6], 1 }
 0x702   :  { %2754 = vsyncpa [#allocation6 + $0x1], 1 }
 0x703   :  { %2755 = vsyncpa [#allocation9], 1 }
 0x704   :  { %2756 = vsyncpa [#allocation12], 1 }
 0x705   :  { %2757 = vsyncpa [#allocation15], 1 }
 0x706   :  { %2759 = vsyncpa [#allocation15 + $0x1], 1 }
 0x707   :  { %2760 = vsyncpa [#allocation7], 1 }
 0x708   :  { %2762 = vsyncpa [#allocation7 + $0x1], 1 }

</bundles_post_ra>
